<compile_context>
chip_gen: v7x
topology: tpu7x:2x2x1
jax: 0.10.0
libtpu: 0.0.40
codegen_flags: <defaults>
</compile_context>

<pallas_src>
import numpy as np
import jax
import jax.numpy as jnp
from jax import lax
from jax.experimental import pallas as pl
from jax.experimental.pallas import tpu as pltpu

# ---- small synthetic config (consistent with the module's shape logic) ----
B = 2            # batch
C = 32           # n_embd
H = 4            # n_head
S = C // H       # head_size = 8
L = 2            # num_layer
TM = 8           # time_maa low-rank dim
TD = 16          # time_decay low-rank dim
V = 64           # vocab_size
VPAD = 128       # lane-dense logits (wrapper slices back to V)
ROWS = 2 + S     # state rows per layer (torch layout)
SC = S * C       # attention-state lane width (s-major layout), 256
EPS = 1e-5

# per-layer state slab: [cm | tm | att | pad]  -> lane-dense multiple of 128
SPAD = 384
# big-weight slab (C rows): [rkvg | att.out | ffn_kr | ffn_v | maa_w1 | decay_w1 | pad]
OFF_RKVG, OFF_OUT, OFF_FKR, OFF_FV = 0, 4 * C, 5 * C, 7 * C
OFF_W1, OFF_DW1 = 8 * C, 8 * C + 5 * TM
WPAD = 384
# small-weight slab (16 rows): [decay_w2 | maa_w2[0..4] | pad]
W2ROWS = max(TD, TM)
W2PAD = 256
# per-layer vector slab: rows 0..14 = 15 (C,)-vectors, row 15 = faaaa spread (SC,)
VROWS = 16


def _ln_k(x, w, b, eps=EPS):
    """manual_layer_norm (kernel variant, rsqrt on EUP)."""
    mean = jnp.mean(x, axis=-1, keepdims=True)
    var = jnp.mean(jnp.square(x - mean), axis=-1, keepdims=True)
    return (x - mean) * lax.rsqrt(var + eps) * w + b


# ----------------------------------------------------------------------------
# Pallas kernel: one grid step == one RWKV block (time mixing + channel mixing)
# ----------------------------------------------------------------------------
def rwkv_kernel(x_ref, st_ref, wm_ref, w2_ref, vec_ref,
                psel_ref, sumsel_ref, gh_ref, ght_ref, mln_ref, head_ref,
                logits_ref, st_out_ref, x_scr):
    f32 = jnp.float32
    layer = pl.program_id(0)

    @pl.when(layer == 0)
    def _():
        mln = mln_ref[...]
        x_scr[...] = _ln_k(x_ref[...], mln[0:1], mln[1:2])

    x = x_scr[...]                                    # (B, C) residual stream

    vs = vec_ref[0]                                   # (16, SC) per-layer vectors (f32)

    def vrow(i):
        return vs[i:i + 1, 0:C]

    ln1w, ln1b, ln2w, ln2b = vrow(0), vrow(1), vrow(2), vrow(3)
    maa_x, maa_w, maa_k = vrow(4), vrow(5), vrow(6)
    maa_v, maa_r, maa_g = vrow(7), vrow(8), vrow(9)
    t_decay, gnw, gnb = vrow(10), vrow(11), vrow(12)
    ffn_mk, ffn_mr = vrow(13), vrow(14)
    fa = vs[15:16, 0:SC]                              # (1, SC) faaaa, s-major layout

    # bf16 weight slabs, upcast once in-register (f32 activations, v5e-friendly).
    # TODO(synk): at production C feed bf16 operands straight to the MXU instead of upcasting.
    wm = wm_ref[0].astype(f32)                        # (C, WPAD)
    w2s = w2_ref[0].astype(f32)                       # (W2ROWS, W2PAD)
    w_rkvg = wm[:, OFF_RKVG:OFF_RKVG + 4 * C]
    w_out = wm[:, OFF_OUT:OFF_OUT + C]
    w_ffn_kr = wm[:, OFF_FKR:OFF_FKR + 2 * C]
    w_ffn_v = wm[:, OFF_FV:OFF_FV + C]
    w1 = wm[:, OFF_W1:OFF_W1 + 5 * TM]
    dw1 = wm[:, OFF_DW1:OFF_DW1 + TD]
    dw2 = w2s[0:TD, 0:C]

    st_prev = st_ref[0]                               # (B, SPAD): [cm | tm | att | pad]
    cm_prev = st_prev[:, 0:C]
    tm_prev = st_prev[:, C:2 * C]
    att_prev = st_prev[:, 2 * C:2 * C + SC]

    # ------------------------------ time mixing ------------------------------
    xn = _ln_k(x, ln1w, ln1b)
    sx = tm_prev - xn
    xxx = xn + sx * maa_x
    th = jnp.tanh(jnp.dot(xxx, w1, preferred_element_type=f32))           # (B, 5*TM)
    # 5 small dense dots (no zero-padded block-diagonal w2)
    m = [jnp.dot(th[:, j * TM:(j + 1) * TM],
                 w2s[0:TM, C * (j + 1):C * (j + 2)],
                 preferred_element_type=f32) for j in range(5)]
    xw = xn + sx * (maa_w + m[0])
    xk = xn + sx * (maa_k + m[1])
    xv = xn + sx * (maa_v + m[2])
    xr = xn + sx * (maa_r + m[3])
    xg = xn + sx * (maa_g + m[4])

    wdec = t_decay + jnp.dot(
        jnp.tanh(jnp.dot(xw, dw1, preferred_element_type=f32)),
        dw2, preferred_element_type=f32)
    wdec = jnp.exp(-jnp.exp(wdec))                                        # (B, C)

    # fused R/K/V/G projection: one (4B,C)@(C,4C) MXU push
    # TODO(synk): at production C use a batched dot_general; 75% of this output is discarded.
    proj_in = jnp.concatenate([xr, xk, xv, xg], axis=0)                   # (4B, C)
    proj = jnp.dot(proj_in, w_rkvg, preferred_element_type=f32)           # (4B, 4C)
    r = proj[0 * B:1 * B, 0 * C:1 * C]
    k = proj[1 * B:2 * B, 1 * C:2 * C]
    v = proj[2 * B:3 * B, 2 * C:3 * C]
    gl = proj[3 * B:4 * B, 3 * C:4 * C]
    g = gl * jax.nn.sigmoid(gl)                                           # SiLU

    # WKV for all heads / all s at once in an s-major (B, S*C) slab:
    # lane s*C + h*S + t holds the (h, s, t) element.
    spread_in = jnp.concatenate([k, r, wdec], axis=0)                     # (3B, C)
    spread = jnp.dot(spread_in, psel_ref[...], preferred_element_type=f32)  # (3B, SC)
    k_sp = spread[0 * B:1 * B]
    r_sp = spread[1 * B:2 * B]
    w_sp = spread[2 * B:3 * B]
    v_tl = jnp.concatenate([v] * S, axis=1)                               # (B, SC) lane tile, no MXU
    a_all = k_sp * v_tl                                                   # outer products k_s * v_t
    att_new = a_all + w_sp * att_prev                                     # new attention state
    x_att = jnp.dot(r_sp * (fa * a_all + att_prev), sumsel_ref[...],
                    preferred_element_type=f32)                           # (B, C) reduce over s

    # group norm over heads: fused sum / sum-of-squares stats, one-pass variance
    stats_in = jnp.concatenate([x_att, x_att * x_att], axis=0)            # (2B, C)
    gsum = jnp.dot(stats_in, gh_ref[...], preferred_element_type=f32) * (1.0 / S)  # (2B, H)
    gsp = jnp.dot(gsum, ght_ref[...], preferred_element_type=f32)         # (2B, C)
    mean_sp = gsp[0:B]
    var_sp = gsp[B:2 * B] - mean_sp * mean_sp
    xnorm = (x_att - mean_sp) * lax.rsqrt(var_sp + EPS) * gnw + gnb
    x = x + jnp.dot(xnorm * g, w_out, preferred_element_type=f32)

    # ----------------------------- channel mixing -----------------------------
    xn2 = _ln_k(x, ln2w, ln2b)
    sx2 = cm_prev - xn2
    xk2 = xn2 + sx2 * ffn_mk
    xr2 = xn2 + sx2 * ffn_mr
    ffn_in = jnp.concatenate([xr2, xk2], axis=0)                          # (2B, C)
    ffn_proj = jnp.dot(ffn_in, w_ffn_kr, preferred_element_type=f32)      # (2B, 2C)
    r2 = jax.nn.sigmoid(ffn_proj[0:B, 0:C])
    kk = jnp.maximum(ffn_proj[B:2 * B, C:2 * C], 0.0)
    kk = kk * kk
    x = x + r2 * jnp.dot(kk, w_ffn_v, preferred_element_type=f32)

    # carry residual, write the whole per-layer state slab with one lane-dense store
    x_scr[...] = x
    pad = jnp.zeros((B, SPAD - 2 * C - SC), f32)
    st_out_ref[0] = jnp.concatenate([xn2, xn, att_new, pad], axis=1)      # (B, 384)

    @pl.when(layer == pl.num_programs(0) - 1)
    def _():
        mln = mln_ref[...]
        xo = _ln_k(x, mln[2:3], mln[3:4])
        logits_ref[...] = jnp.dot(xo, head_ref[...].astype(f32),
                                  preferred_element_type=f32)


# ----------------------------------------------------------------------------
# Host-side packing (hoisted out of the per-token path) + layout conversion
# ----------------------------------------------------------------------------
def make_selectors():
    cs = np.arange(C)
    psel = np.zeros((C, SC), np.float32)    # spread channel h*S+s to lane s*C + h*S + t
    sumsel = np.zeros((SC, C), np.float32)  # reduce the S stacked blocks back to C lanes
    for s in range(S):
        psel[(cs // S) * S + s, s * C + cs] = 1.0
        sumsel[s * C + cs, cs] = 1.0
    gh = np.zeros((C, H), np.float32)       # per-head (group) sum selector
    gh[cs, cs // S] = 1.0
    return (jnp.asarray(psel), jnp.asarray(sumsel),
            jnp.asarray(gh), jnp.asarray(gh.T))


def pack_params(P, weight_dtype=jnp.bfloat16):
    """One-time weight packing.  Weight matrices stream as bf16 (decode is HBM-bound);
    per-layer vectors / activations stay f32.

    TODO(synk): int8 (v6e) / fp8 (v7x) per-column-scaled weights for another ~2x.
    TODO(synk): at production C / vocab, column-tile w_rkvg and the head matmul with
                an extra grid axis so a weight block + double buffer fits v7x's 64 MiB VMEM.
    """
    wmat, w2s, vecs = [], [], []
    for blk in P['blocks']:
        wm = jnp.zeros((C, WPAD), jnp.float32)
        wm = wm.at[:, OFF_RKVG:OFF_RKVG + 4 * C].set(
            jnp.concatenate([blk['att.receptance.weight'].T, blk['att.key.weight'].T,
                             blk['att.value.weight'].T, blk['att.gate.weight'].T], axis=1))
        wm = wm.at[:, OFF_OUT:OFF_OUT + C].set(blk['att.output.weight'].T)
        wm = wm.at[:, OFF_FKR:OFF_FKR + 2 * C].set(
            jnp.concatenate([blk['ffn.receptance.weight'].T,
                             blk['ffn.key.weight'].T], axis=1))
        wm = wm.at[:, OFF_FV:OFF_FV + C].set(blk['ffn.value.weight'].T)
        wm = wm.at[:, OFF_W1:OFF_W1 + 5 * TM].set(blk['att.time_maa_w1'])
        wm = wm.at[:, OFF_DW1:OFF_DW1 + TD].set(blk['att.time_decay_w1'])
        wmat.append(wm)

        w2 = jnp.zeros((W2ROWS, W2PAD), jnp.float32)
        w2 = w2.at[0:TD, 0:C].set(blk['att.time_decay_w2'])
        for j in range(5):
            w2 = w2.at[0:TM, C * (j + 1):C * (j + 2)].set(blk['att.time_maa_w2'][j])
        w2s.append(w2)

        vrows = jnp.stack([
            blk['ln1.weight'], blk['ln1.bias'], blk['ln2.weight'], blk['ln2.bias'],
            blk['att.time_maa_x'], blk['att.time_maa_w'], blk['att.time_maa_k'],
            blk['att.time_maa_v'], blk['att.time_maa_r'], blk['att.time_maa_g'],
            blk['att.time_decay'], blk['att.ln_x.weight'], blk['att.ln_x.bias'],
            blk['ffn.time_maa_k'], blk['ffn.time_maa_r']], axis=0)            # (15, C)
        fa = blk['att.time_faaaa'][:, :, 0]                                    # (H, S)
        fa_lane = jnp.repeat(fa.T, S, axis=1).reshape(SC)   # lane s*C + h*S + t -> faaaa[h, s]
        vslab = jnp.zeros((VROWS, SC), jnp.float32)
        vslab = vslab.at[0:15, 0:C].set(vrows)
        vslab = vslab.at[15, :].set(fa_lane)
        vecs.append(vslab)

    psel, sumsel, gh, ght = make_selectors()
    head_pad = jnp.zeros((C, VPAD), jnp.float32).at[:, :V].set(P['head_w'].T)
    mln = jnp.stack([P['ln0_w'], P['ln0_b'], P['ln_out_w'], P['ln_out_b']], axis=0)
    return dict(
        emb=P['emb'],
        wmat=jnp.stack(wmat).astype(weight_dtype),
        w2=jnp.stack(w2s).astype(weight_dtype),
        vecs=jnp.stack(vecs),
        psel=psel, sumsel=sumsel, gh=gh, ght=ght,
        mln=mln,
        head=head_pad.astype(weight_dtype))


def state_to_internal(state):
    """(B, L*ROWS, C) torch layout -> (L, B, SPAD) internal slab (done once, not per step).

    Torch attention rows flatten as (H, S, S); the kernel uses an s-major lane layout
    (lane = s*C + h*S + t), hence the (H,S,S) -> (S,H,S) transpose here.
    """
    slabs = []
    for l in range(L):
        base = ROWS * l
        cm = state[:, base + 0]
        tm = state[:, base + 1]
        att = state[:, base + 2: base + 2 + S].reshape(B, H, S, S)
        att = att.transpose(0, 2, 1, 3).reshape(B, SC)
        pad = jnp.zeros((B, SPAD - 2 * C - SC), state.dtype)
        slabs.append(jnp.concatenate([cm, tm, att, pad], axis=1))
    return jnp.stack(slabs, axis=0)


def internal_to_state(slab):
    """(L, B, SPAD) internal slab -> (B, L*ROWS, C) torch layout."""
    blocks = []
    for l in range(L):
        cm = slab[l, :, 0:C][:, None, :]
        tm = slab[l, :, C:2 * C][:, None, :]
        att = slab[l, :, 2 * C:2 * C + SC].reshape(B, S, H, S)
        att = att.transpose(0, 2, 1, 3).reshape(B, S, C)
        blocks.append(jnp.concatenate([cm, tm, att], axis=1))
    return jnp.concatenate(blocks, axis=1)


def rwkv_forward(token, state_slab, pk):
    """Single-token forward; `pk` (packed weights) and `state_slab` (internal layout)
    persist across decode steps."""
    x_emb = pk['emb'][token]   # TODO(synk): data-dependent embedding gather stays in JAX glue

    def per_layer(shape):
        return pl.BlockSpec((1,) + shape, lambda l: (l,) + (0,) * len(shape))

    def resident(shape):
        return pl.BlockSpec(shape, lambda l: (0,) * len(shape))

    args_and_specs = [
        (x_emb,         resident((B, C))),
        (state_slab,    per_layer((B, SPAD))),
        (pk['wmat'],    per_layer((C, WPAD))),
        (pk['w2'],      per_layer((W2ROWS, W2PAD))),
        (pk['vecs'],    per_layer((VROWS, SC))),
        (pk['psel'],    resident((C, SC))),
        (pk['sumsel'],  resident((SC, C))),
        (pk['gh'],      resident((C, H))),
        (pk['ght'],     resident((H, C))),
        (pk['mln'],     resident((4, C))),
        (pk['head'],    resident((C, VPAD))),
    ]
    arrays = [a for a, _ in args_and_specs]
    in_specs = [s for _, s in args_and_specs]

    out_shape = (jax.ShapeDtypeStruct((B, VPAD), jnp.float32),
                 jax.ShapeDtypeStruct((L, B, SPAD), jnp.float32))
    out_specs = (resident((B, VPAD)), per_layer((B, SPAD)))

    # TODO(synk): v7x has 2 TensorCores: add a leading 'parallel' batch/head grid axis
    #             (or pl.core_map over a 2-core mesh) so the second core isn't idle.
    # TODO(synk): on v5e/v6e at production L, consider unrolling 2 layers per grid step.
    logits_pad, slab_out = pl.pallas_call(
        rwkv_kernel,
        out_shape=out_shape,
        grid_spec=pltpu.PrefetchScalarGridSpec(
            num_scalar_prefetch=0,
            grid=(L,),
            in_specs=in_specs,
            out_specs=out_specs,
            scratch_shapes=[pltpu.VMEM((B, C), jnp.float32)]),
        compiler_params=pltpu.CompilerParams(
            dimension_semantics=("arbitrary",)),
    )(*arrays)
    return logits_pad[:, :V], slab_out


# ----------------------------------------------------------------------------
# Pure-JAX reference (direct transcription of the PyTorch math) for checking
# ----------------------------------------------------------------------------
def mm(a, b):
    return jnp.matmul(a, b, precision=jax.lax.Precision.HIGHEST)


def _ln_ref(x, w, b, eps=EPS):
    mean = jnp.mean(x, axis=-1, keepdims=True)
    var = jnp.mean(jnp.square(x - mean), axis=-1, keepdims=True)
    return (x - mean) / jnp.sqrt(var + eps) * w + b


def _group_norm(x, ngroups, w, b, eps=EPS):
    N, Cc = x.shape
    xg = x.reshape(N, ngroups, Cc // ngroups)
    mean = jnp.mean(xg, axis=2, keepdims=True)
    var = jnp.mean(jnp.square(xg - mean), axis=2, keepdims=True)
    xn = ((xg - mean) / jnp.sqrt(var + eps)).reshape(N, Cc)
    return xn * w + b


def ref_forward(token, state, P):
    x = P['emb'][token]
    x = _ln_ref(x, P['ln0_w'], P['ln0_b'])
    new_state = state
    for i in range(L):
        blk = P['blocks'][i]
        base = ROWS * i
        # time mixing
        xn = _ln_ref(x, blk['ln1.weight'], blk['ln1.bias'])
        sx = state[:, base + 1] - xn
        new_state = new_state.at[:, base + 1].set(xn)
        xxx = xn + sx * blk['att.time_maa_x']
        xxx = jnp.tanh(mm(xxx, blk['att.time_maa_w1'])).reshape(B, 5, 1, TM)
        xxx = mm(xxx, blk['att.time_maa_w2']).reshape(B, 5, C)
        mw, mk, mv, mr, mg = [xxx[:, j] for j in range(5)]
        xw = xn + sx * (blk['att.time_maa_w'] + mw)
        xk = xn + sx * (blk['att.time_maa_k'] + mk)
        xv = xn + sx * (blk['att.time_maa_v'] + mv)
        xr = xn + sx * (blk['att.time_maa_r'] + mr)
        xg = xn + sx * (blk['att.time_maa_g'] + mg)
        w = blk['att.time_decay'] + mm(jnp.tanh(mm(xw, blk['att.time_decay_w1'])),
                                       blk['att.time_decay_w2'])
        w = jnp.exp(-jnp.exp(w.reshape(B, H, S, 1)))
        r = mm(xr, blk['att.receptance.weight'].T).reshape(B, H, 1, S)
        k = mm(xk, blk['att.key.weight'].T).reshape(B, H, S, 1)
        v = mm(xv, blk['att.value.weight'].T).reshape(B, H, 1, S)
        gl = mm(xg, blk['att.gate.weight'].T)
        g = gl * jax.nn.sigmoid(gl)
        s = state[:, base + 2: base + 2 + S].reshape(B, H, S, S)
        a = mm(k, v)
        xo = mm(r, blk['att.time_faaaa'] * a + s)
        s_new = a + w * s
        new_state = new_state.at[:, base + 2: base + 2 + S].set(s_new.reshape(B, S, C))
        xo = xo.reshape(B, C)
        xo = _group_norm(xo, H, blk['att.ln_x.weight'], blk['att.ln_x.bias']) * g
        x = x + mm(xo, blk['att.output.weight'].T)
        # channel mixing
        xn2 = _ln_ref(x, blk['ln2.weight'], blk['ln2.bias'])
        sx2 = state[:, base + 0] - xn2
        new_state = new_state.at[:, base + 0].set(xn2)
        xk2 = xn2 + sx2 * blk['ffn.time_maa_k']
        xr2 = xn2 + sx2 * blk['ffn.time_maa_r']
        r2 = jax.nn.sigmoid(mm(xr2, blk['ffn.receptance.weight'].T))
        kk = jnp.square(jnp.maximum(mm(xk2, blk['ffn.key.weight'].T), 0.0))
        x = x + r2 * mm(kk, blk['ffn.value.weight'].T)
    x = _ln_ref(x, P['ln_out_w'], P['ln_out_b'])
    logits = mm(x, P['head_w'].T)
    return logits, new_state


# ----------------------------------------------------------------------------
# Deterministic synthetic parameters
# ----------------------------------------------------------------------------
def make_params():
    keys = iter(jax.random.split(jax.random.PRNGKey(0), 256))

    def rnd(shape, scale=0.2):
        return scale * jax.random.normal(next(keys), shape, dtype=jnp.float32)

    def ones_ish(shape):
        return 1.0 + rnd(shape, 0.1)

    blocks = []
    for _ in range(L):
        blocks.append({
            'ln1.weight': ones_ish((C,)), 'ln1.bias': rnd((C,), 0.1),
            'ln2.weight': ones_ish((C,)), 'ln2.bias': rnd((C,), 0.1),
            'att.time_maa_x': rnd((C,), 0.3), 'att.time_maa_w': rnd((C,), 0.3),
            'att.time_maa_k': rnd((C,), 0.3), 'att.time_maa_v': rnd((C,), 0.3),
            'att.time_maa_r': rnd((C,), 0.3), 'att.time_maa_g': rnd((C,), 0.3),
            'att.time_maa_w1': rnd((C, 5 * TM), 0.2),
            'att.time_maa_w2': rnd((5, TM, C), 0.2),
            'att.time_decay': rnd((C,), 0.5),
            'att.time_decay_w1': rnd((C, TD), 0.2),
            'att.time_decay_w2': rnd((TD, C), 0.2),
            'att.time_faaaa': rnd((H, S, 1), 0.3),
            'att.receptance.weight': rnd((C, C), 0.15),
            'att.key.weight': rnd((C, C), 0.15),
            'att.value.weight': rnd((C, C), 0.15),
            'att.output.weight': rnd((C, C), 0.15),
            'att.gate.weight': rnd((C, C), 0.15),
            'att.ln_x.weight': ones_ish((C,)), 'att.ln_x.bias': rnd((C,), 0.1),
            'ffn.time_maa_k': rnd((C,), 0.3), 'ffn.time_maa_r': rnd((C,), 0.3),
            'ffn.key.weight': rnd((C, C), 0.15),
            'ffn.receptance.weight': rnd((C, C), 0.15),
            'ffn.value.weight': rnd((C, C), 0.15),
        })
    return {
        'emb': rnd((V, C), 0.3),
        'ln0_w': ones_ish((C,)), 'ln0_b': rnd((C,), 0.1),
        'ln_out_w': ones_ish((C,)), 'ln_out_b': rnd((C,), 0.1),
        'head_w': rnd((V, C), 0.2),
        'blocks': blocks,
    }


if __name__ == "__main__":
    P = make_params()
    kt, ks = jax.random.split(jax.random.PRNGKey(1))
    token = jax.random.randint(kt, (B,), 0, V)
    state = 0.2 * jax.random.normal(ks, (B, L * ROWS, C), dtype=jnp.float32)

    # one-time packing / layout conversion (hoisted out of the per-token decode path)
    pk = pack_params(P)
    state_int = state_to_internal(state)
    step = jax.jit(rwkv_forward)

    logits, state_int_new = step(token, state_int, pk)
    jax.block_until_ready((logits, state_int_new))
    new_state = internal_to_state(state_int_new)

    ref_logits, ref_state = ref_forward(token, state, P)
    # tolerance covers bf16 weight streaming (f32 accumulation) vs the f32 reference
    np.testing.assert_allclose(np.asarray(logits), np.asarray(ref_logits),
                               rtol=3e-2, atol=3e-2)
    np.testing.assert_allclose(np.asarray(new_state), np.asarray(ref_state),
                               rtol=3e-2, atol=3e-2)
    assert logits.shape == (B, V) and new_state.shape == (B, L * ROWS, C)
    print("KERNEL_OK")
</pallas_src>

<mosaic_0001>
module attributes {stable_mosaic.version = 11 : i64} {
  func.func @rwkv_kernel(%arg0: i32, %arg1: memref<2x32xf32, #tpu.memory_space<vmem>>, %arg2: memref<1x2x384xf32, #tpu.memory_space<vmem>>, %arg3: memref<1x32x384xbf16, #tpu.memory_space<vmem>>, %arg4: memref<1x16x256xbf16, #tpu.memory_space<vmem>>, %arg5: memref<1x16x256xf32, #tpu.memory_space<vmem>>, %arg6: memref<32x256xf32, #tpu.memory_space<vmem>>, %arg7: memref<256x32xf32, #tpu.memory_space<vmem>>, %arg8: memref<32x4xf32, #tpu.memory_space<vmem>>, %arg9: memref<4x32xf32, #tpu.memory_space<vmem>>, %arg10: memref<4x32xf32, #tpu.memory_space<vmem>>, %arg11: memref<32x128xbf16, #tpu.memory_space<vmem>>, %arg12: memref<2x128xf32, #tpu.memory_space<vmem>>, %arg13: memref<1x2x384xf32, #tpu.memory_space<vmem>>, %arg14: memref<2x32xf32, #tpu.memory_space<vmem>>) attributes {dimension_semantics = [#tpu.dimension_semantics<arbitrary>], iteration_bounds = array<i64: 2>, scalar_prefetch = 0 : i64, scratch_operands = 1 : i64, tpu.core_type = #tpu.core_type<tc>, window_params = [{pipeline_mode = #tpu.pipeline_mode<synchronous>, transform_indices = @transform_0, window_bounds = array<i64: 2, 32>}, {transform_indices = @transform_1, window_bounds = array<i64: 1, 2, 384>}, {transform_indices = @transform_2, window_bounds = array<i64: 1, 32, 384>}, {transform_indices = @transform_3, window_bounds = array<i64: 1, 16, 256>}, {transform_indices = @transform_4, window_bounds = array<i64: 1, 16, 256>}, {pipeline_mode = #tpu.pipeline_mode<synchronous>, transform_indices = @transform_5, window_bounds = array<i64: 32, 256>}, {pipeline_mode = #tpu.pipeline_mode<synchronous>, transform_indices = @transform_6, window_bounds = array<i64: 256, 32>}, {pipeline_mode = #tpu.pipeline_mode<synchronous>, transform_indices = @transform_7, window_bounds = array<i64: 32, 4>}, {pipeline_mode = #tpu.pipeline_mode<synchronous>, transform_indices = @transform_8, window_bounds = array<i64: 4, 32>}, {pipeline_mode = #tpu.pipeline_mode<synchronous>, transform_indices = @transform_9, window_bounds = array<i64: 4, 32>}, {pipeline_mode = #tpu.pipeline_mode<synchronous>, transform_indices = @transform_10, window_bounds = array<i64: 32, 128>}, {pipeline_mode = #tpu.pipeline_mode<synchronous>, transform_indices = @transform_11, window_bounds = array<i64: 2, 128>}, {transform_indices = @transform_12, window_bounds = array<i64: 1, 2, 384>}]} {
    %c0_i32 = arith.constant 0 : i32
    %0 = arith.cmpi eq, %arg0, %c0_i32 : i32
    %1 = arith.extui %0 : i1 to i32
    %c0_i32_0 = arith.constant 0 : i32
    %2 = arith.cmpi ne, %1, %c0_i32_0 : i32
    scf.if %2 {
      %c0_60 = arith.constant 0 : index
      %c0_61 = arith.constant 0 : index
      %217 = vector.load %arg10[%c0_60, %c0_61] : memref<4x32xf32, #tpu.memory_space<vmem>>, vector<4x32xf32>
      %c0_62 = arith.constant 0 : index
      %c0_63 = arith.constant 0 : index
      %218 = vector.load %arg1[%c0_62, %c0_63] : memref<2x32xf32, #tpu.memory_space<vmem>>, vector<2x32xf32>
      %219 = vector.extract_strided_slice %217 {offsets = [0, 0], sizes = [1, 32], strides = [1, 1]} : vector<4x32xf32> to vector<1x32xf32>
      %220 = vector.extract_strided_slice %217 {offsets = [1, 0], sizes = [1, 32], strides = [1, 1]} : vector<4x32xf32> to vector<1x32xf32>
      %cst_64 = arith.constant dense<0.000000e+00> : vector<2xf32>
      %221 = vector.multi_reduction <add>, %218, %cst_64 [1] : vector<2x32xf32> to vector<2xf32>
      %222 = vector.shape_cast %221 : vector<2xf32> to vector<2x1xf32>
      %cst_65 = arith.constant 3.200000e+01 : f32
      %223 = vector.broadcast %cst_65 : f32 to vector<2x1xf32>
      %224 = arith.divf %222, %223 : vector<2x1xf32>
      %225 = vector.broadcast %224 : vector<2x1xf32> to vector<2x32xf32>
      %226 = arith.subf %218, %225 : vector<2x32xf32>
      %227 = arith.mulf %226, %226 : vector<2x32xf32>
      %cst_66 = arith.constant dense<0.000000e+00> : vector<2xf32>
      %228 = vector.multi_reduction <add>, %227, %cst_66 [1] : vector<2x32xf32> to vector<2xf32>
      %229 = vector.shape_cast %228 : vector<2xf32> to vector<2x1xf32>
      %cst_67 = arith.constant 3.200000e+01 : f32
      %230 = vector.broadcast %cst_67 : f32 to vector<2x1xf32>
      %231 = arith.divf %229, %230 : vector<2x1xf32>
      %232 = vector.broadcast %224 : vector<2x1xf32> to vector<2x32xf32>
      %233 = arith.subf %218, %232 : vector<2x32xf32>
      %cst_68 = arith.constant 9.99999974E-6 : f32
      %234 = vector.broadcast %cst_68 : f32 to vector<2x1xf32>
      %235 = arith.addf %231, %234 : vector<2x1xf32>
      %236 = math.rsqrt %235 : vector<2x1xf32>
      %237 = vector.broadcast %236 : vector<2x1xf32> to vector<2x32xf32>
      %238 = arith.mulf %233, %237 : vector<2x32xf32>
      %239 = vector.broadcast %219 : vector<1x32xf32> to vector<2x32xf32>
      %240 = arith.mulf %238, %239 : vector<2x32xf32>
      %241 = vector.broadcast %220 : vector<1x32xf32> to vector<2x32xf32>
      %242 = arith.addf %240, %241 : vector<2x32xf32>
      %c0_69 = arith.constant 0 : index
      %c0_70 = arith.constant 0 : index
      %243 = vector.load %arg14[%c0_69, %c0_70] : memref<2x32xf32, #tpu.memory_space<vmem>>, vector<2x32xf32>
      tpu.vector_store %arg14[%c0_69, %c0_70], %242 {strides = array<i32>} : memref<2x32xf32, #tpu.memory_space<vmem>>, vector<2x32xf32>,
    } else {
    }
    %c0 = arith.constant 0 : index
    %c0_1 = arith.constant 0 : index
    %3 = vector.load %arg14[%c0, %c0_1] : memref<2x32xf32, #tpu.memory_space<vmem>>, vector<2x32xf32>
    %c0_2 = arith.constant 0 : index
    %c0_3 = arith.constant 0 : index
    %c0_4 = arith.constant 0 : index
    %4 = vector.load %arg5[%c0_2, %c0_3, %c0_4] : memref<1x16x256xf32, #tpu.memory_space<vmem>>, vector<1x16x256xf32>
    %5 = vector.shape_cast %4 : vector<1x16x256xf32> to vector<16x256xf32>
    %6 = vector.extract_strided_slice %5 {offsets = [0, 0], sizes = [1, 32], strides = [1, 1]} : vector<16x256xf32> to vector<1x32xf32>
    %7 = vector.extract_strided_slice %5 {offsets = [1, 0], sizes = [1, 32], strides = [1, 1]} : vector<16x256xf32> to vector<1x32xf32>
    %8 = vector.extract_strided_slice %5 {offsets = [2, 0], sizes = [1, 32], strides = [1, 1]} : vector<16x256xf32> to vector<1x32xf32>
    %9 = vector.extract_strided_slice %5 {offsets = [3, 0], sizes = [1, 32], strides = [1, 1]} : vector<16x256xf32> to vector<1x32xf32>
    %10 = vector.extract_strided_slice %5 {offsets = [4, 0], sizes = [1, 32], strides = [1, 1]} : vector<16x256xf32> to vector<1x32xf32>
    %11 = vector.extract_strided_slice %5 {offsets = [5, 0], sizes = [1, 32], strides = [1, 1]} : vector<16x256xf32> to vector<1x32xf32>
    %12 = vector.extract_strided_slice %5 {offsets = [6, 0], sizes = [1, 32], strides = [1, 1]} : vector<16x256xf32> to vector<1x32xf32>
    %13 = vector.extract_strided_slice %5 {offsets = [7, 0], sizes = [1, 32], strides = [1, 1]} : vector<16x256xf32> to vector<1x32xf32>
    %14 = vector.extract_strided_slice %5 {offsets = [8, 0], sizes = [1, 32], strides = [1, 1]} : vector<16x256xf32> to vector<1x32xf32>
    %15 = vector.extract_strided_slice %5 {offsets = [9, 0], sizes = [1, 32], strides = [1, 1]} : vector<16x256xf32> to vector<1x32xf32>
    %16 = vector.extract_strided_slice %5 {offsets = [10, 0], sizes = [1, 32], strides = [1, 1]} : vector<16x256xf32> to vector<1x32xf32>
    %17 = vector.extract_strided_slice %5 {offsets = [11, 0], sizes = [1, 32], strides = [1, 1]} : vector<16x256xf32> to vector<1x32xf32>
    %18 = vector.extract_strided_slice %5 {offsets = [12, 0], sizes = [1, 32], strides = [1, 1]} : vector<16x256xf32> to vector<1x32xf32>
    %19 = vector.extract_strided_slice %5 {offsets = [13, 0], sizes = [1, 32], strides = [1, 1]} : vector<16x256xf32> to vector<1x32xf32>
    %20 = vector.extract_strided_slice %5 {offsets = [14, 0], sizes = [1, 32], strides = [1, 1]} : vector<16x256xf32> to vector<1x32xf32>
    %21 = vector.extract_strided_slice %5 {offsets = [15, 0], sizes = [1, 256], strides = [1, 1]} : vector<16x256xf32> to vector<1x256xf32>
    %c0_5 = arith.constant 0 : index
    %c0_6 = arith.constant 0 : index
    %c0_7 = arith.constant 0 : index
    %22 = vector.load %arg3[%c0_5, %c0_6, %c0_7] : memref<1x32x384xbf16, #tpu.memory_space<vmem>>, vector<1x32x384xbf16>
    %23 = vector.shape_cast %22 : vector<1x32x384xbf16> to vector<32x384xbf16>
    %24 = arith.extf %23 : vector<32x384xbf16> to vector<32x384xf32>
    %c0_8 = arith.constant 0 : index
    %c0_9 = arith.constant 0 : index
    %c0_10 = arith.constant 0 : index
    %25 = vector.load %arg4[%c0_8, %c0_9, %c0_10] : memref<1x16x256xbf16, #tpu.memory_space<vmem>>, vector<1x16x256xbf16>
    %26 = vector.shape_cast %25 : vector<1x16x256xbf16> to vector<16x256xbf16>
    %27 = arith.extf %26 : vector<16x256xbf16> to vector<16x256xf32>
    %28 = vector.extract_strided_slice %24 {offsets = [0, 0], sizes = [32, 128], strides = [1, 1]} : vector<32x384xf32> to vector<32x128xf32>
    %29 = vector.extract_strided_slice %24 {offsets = [0, 128], sizes = [32, 32], strides = [1, 1]} : vector<32x384xf32> to vector<32x32xf32>
    %30 = vector.extract_strided_slice %24 {offsets = [0, 160], sizes = [32, 64], strides = [1, 1]} : vector<32x384xf32> to vector<32x64xf32>
    %31 = vector.extract_strided_slice %24 {offsets = [0, 224], sizes = [32, 32], strides = [1, 1]} : vector<32x384xf32> to vector<32x32xf32>
    %32 = vector.extract_strided_slice %24 {offsets = [0, 256], sizes = [32, 40], strides = [1, 1]} : vector<32x384xf32> to vector<32x40xf32>
    %33 = vector.extract_strided_slice %24 {offsets = [0, 296], sizes = [32, 16], strides = [1, 1]} : vector<32x384xf32> to vector<32x16xf32>
    %34 = vector.extract_strided_slice %27 {offsets = [0, 0], sizes = [16, 32], strides = [1, 1]} : vector<16x256xf32> to vector<16x32xf32>
    %c0_11 = arith.constant 0 : index
    %c0_12 = arith.constant 0 : index
    %c0_13 = arith.constant 0 : index
    %35 = vector.load %arg2[%c0_11, %c0_12, %c0_13] : memref<1x2x384xf32, #tpu.memory_space<vmem>>, vector<1x2x384xf32>
    %36 = vector.shape_cast %35 : vector<1x2x384xf32> to vector<2x384xf32>
    %37 = vector.extract_strided_slice %36 {offsets = [0, 0], sizes = [2, 32], strides = [1, 1]} : vector<2x384xf32> to vector<2x32xf32>
    %38 = vector.extract_strided_slice %36 {offsets = [0, 32], sizes = [2, 32], strides = [1, 1]} : vector<2x384xf32> to vector<2x32xf32>
    %39 = vector.extract_strided_slice %36 {offsets = [0, 64], sizes = [2, 256], strides = [1, 1]} : vector<2x384xf32> to vector<2x256xf32>
    %cst = arith.constant dense<0.000000e+00> : vector<2xf32>
    %40 = vector.multi_reduction <add>, %3, %cst [1] : vector<2x32xf32> to vector<2xf32>
    %41 = vector.shape_cast %40 : vector<2xf32> to vector<2x1xf32>
    %cst_14 = arith.constant 3.200000e+01 : f32
    %42 = vector.broadcast %cst_14 : f32 to vector<2x1xf32>
    %43 = arith.divf %41, %42 : vector<2x1xf32>
    %44 = vector.broadcast %43 : vector<2x1xf32> to vector<2x32xf32>
    %45 = arith.subf %3, %44 : vector<2x32xf32>
    %46 = arith.mulf %45, %45 : vector<2x32xf32>
    %cst_15 = arith.constant dense<0.000000e+00> : vector<2xf32>
    %47 = vector.multi_reduction <add>, %46, %cst_15 [1] : vector<2x32xf32> to vector<2xf32>
    %48 = vector.shape_cast %47 : vector<2xf32> to vector<2x1xf32>
    %cst_16 = arith.constant 3.200000e+01 : f32
    %49 = vector.broadcast %cst_16 : f32 to vector<2x1xf32>
    %50 = arith.divf %48, %49 : vector<2x1xf32>
    %51 = vector.broadcast %43 : vector<2x1xf32> to vector<2x32xf32>
    %52 = arith.subf %3, %51 : vector<2x32xf32>
    %cst_17 = arith.constant 9.99999974E-6 : f32
    %53 = vector.broadcast %cst_17 : f32 to vector<2x1xf32>
    %54 = arith.addf %50, %53 : vector<2x1xf32>
    %55 = math.rsqrt %54 : vector<2x1xf32>
    %56 = vector.broadcast %55 : vector<2x1xf32> to vector<2x32xf32>
    %57 = arith.mulf %52, %56 : vector<2x32xf32>
    %58 = vector.broadcast %6 : vector<1x32xf32> to vector<2x32xf32>
    %59 = arith.mulf %57, %58 : vector<2x32xf32>
    %60 = vector.broadcast %7 : vector<1x32xf32> to vector<2x32xf32>
    %61 = arith.addf %59, %60 : vector<2x32xf32>
    %62 = arith.subf %38, %61 : vector<2x32xf32>
    %63 = vector.broadcast %10 : vector<1x32xf32> to vector<2x32xf32>
    %64 = arith.mulf %62, %63 : vector<2x32xf32>
    %65 = arith.addf %61, %64 : vector<2x32xf32>
    %cst_18 = arith.constant dense<0.000000e+00> : vector<2x40xf32>
    %66 = tpu.matmul %65, %32, %cst_18 {dimension_numbers = #tpu.dot_dimension_numbers<[1], [0], [0], [1], [0, 0, 1, 1], [], []>} : vector<2x32xf32>, vector<32x40xf32>, vector<2x40xf32> -> vector<2x40xf32>
    %67 = math.tanh %66 : vector<2x40xf32>
    %68 = vector.extract_strided_slice %67 {offsets = [0, 0], sizes = [2, 8], strides = [1, 1]} : vector<2x40xf32> to vector<2x8xf32>
    %69 = vector.extract_strided_slice %27 {offsets = [0, 32], sizes = [8, 32], strides = [1, 1]} : vector<16x256xf32> to vector<8x32xf32>
    %cst_19 = arith.constant dense<0.000000e+00> : vector<2x32xf32>
    %70 = tpu.matmul %68, %69, %cst_19 {dimension_numbers = #tpu.dot_dimension_numbers<[1], [0], [0], [1], [0, 0, 1, 1], [], []>} : vector<2x8xf32>, vector<8x32xf32>, vector<2x32xf32> -> vector<2x32xf32>
    %71 = vector.extract_strided_slice %67 {offsets = [0, 8], sizes = [2, 8], strides = [1, 1]} : vector<2x40xf32> to vector<2x8xf32>
    %72 = vector.extract_strided_slice %27 {offsets = [0, 64], sizes = [8, 32], strides = [1, 1]} : vector<16x256xf32> to vector<8x32xf32>
    %cst_20 = arith.constant dense<0.000000e+00> : vector<2x32xf32>
    %73 = tpu.matmul %71, %72, %cst_20 {dimension_numbers = #tpu.dot_dimension_numbers<[1], [0], [0], [1], [0, 0, 1, 1], [], []>} : vector<2x8xf32>, vector<8x32xf32>, vector<2x32xf32> -> vector<2x32xf32>
    %74 = vector.extract_strided_slice %67 {offsets = [0, 16], sizes = [2, 8], strides = [1, 1]} : vector<2x40xf32> to vector<2x8xf32>
    %75 = vector.extract_strided_slice %27 {offsets = [0, 96], sizes = [8, 32], strides = [1, 1]} : vector<16x256xf32> to vector<8x32xf32>
    %cst_21 = arith.constant dense<0.000000e+00> : vector<2x32xf32>
    %76 = tpu.matmul %74, %75, %cst_21 {dimension_numbers = #tpu.dot_dimension_numbers<[1], [0], [0], [1], [0, 0, 1, 1], [], []>} : vector<2x8xf32>, vector<8x32xf32>, vector<2x32xf32> -> vector<2x32xf32>
    %77 = vector.extract_strided_slice %67 {offsets = [0, 24], sizes = [2, 8], strides = [1, 1]} : vector<2x40xf32> to vector<2x8xf32>
    %78 = vector.extract_strided_slice %27 {offsets = [0, 128], sizes = [8, 32], strides = [1, 1]} : vector<16x256xf32> to vector<8x32xf32>
    %cst_22 = arith.constant dense<0.000000e+00> : vector<2x32xf32>
    %79 = tpu.matmul %77, %78, %cst_22 {dimension_numbers = #tpu.dot_dimension_numbers<[1], [0], [0], [1], [0, 0, 1, 1], [], []>} : vector<2x8xf32>, vector<8x32xf32>, vector<2x32xf32> -> vector<2x32xf32>
    %80 = vector.extract_strided_slice %67 {offsets = [0, 32], sizes = [2, 8], strides = [1, 1]} : vector<2x40xf32> to vector<2x8xf32>
    %81 = vector.extract_strided_slice %27 {offsets = [0, 160], sizes = [8, 32], strides = [1, 1]} : vector<16x256xf32> to vector<8x32xf32>
    %cst_23 = arith.constant dense<0.000000e+00> : vector<2x32xf32>
    %82 = tpu.matmul %80, %81, %cst_23 {dimension_numbers = #tpu.dot_dimension_numbers<[1], [0], [0], [1], [0, 0, 1, 1], [], []>} : vector<2x8xf32>, vector<8x32xf32>, vector<2x32xf32> -> vector<2x32xf32>
    %83 = vector.broadcast %11 : vector<1x32xf32> to vector<2x32xf32>
    %84 = arith.addf %83, %70 : vector<2x32xf32>
    %85 = arith.mulf %62, %84 : vector<2x32xf32>
    %86 = arith.addf %61, %85 : vector<2x32xf32>
    %87 = vector.broadcast %12 : vector<1x32xf32> to vector<2x32xf32>
    %88 = arith.addf %87, %73 : vector<2x32xf32>
    %89 = arith.mulf %62, %88 : vector<2x32xf32>
    %90 = arith.addf %61, %89 : vector<2x32xf32>
    %91 = vector.broadcast %13 : vector<1x32xf32> to vector<2x32xf32>
    %92 = arith.addf %91, %76 : vector<2x32xf32>
    %93 = arith.mulf %62, %92 : vector<2x32xf32>
    %94 = arith.addf %61, %93 : vector<2x32xf32>
    %95 = vector.broadcast %14 : vector<1x32xf32> to vector<2x32xf32>
    %96 = arith.addf %95, %79 : vector<2x32xf32>
    %97 = arith.mulf %62, %96 : vector<2x32xf32>
    %98 = arith.addf %61, %97 : vector<2x32xf32>
    %99 = vector.broadcast %15 : vector<1x32xf32> to vector<2x32xf32>
    %100 = arith.addf %99, %82 : vector<2x32xf32>
    %101 = arith.mulf %62, %100 : vector<2x32xf32>
    %102 = arith.addf %61, %101 : vector<2x32xf32>
    %cst_24 = arith.constant dense<0.000000e+00> : vector<2x16xf32>
    %103 = tpu.matmul %86, %33, %cst_24 {dimension_numbers = #tpu.dot_dimension_numbers<[1], [0], [0], [1], [0, 0, 1, 1], [], []>} : vector<2x32xf32>, vector<32x16xf32>, vector<2x16xf32> -> vector<2x16xf32>
    %104 = math.tanh %103 : vector<2x16xf32>
    %cst_25 = arith.constant dense<0.000000e+00> : vector<2x32xf32>
    %105 = tpu.matmul %104, %34, %cst_25 {dimension_numbers = #tpu.dot_dimension_numbers<[1], [0], [0], [1], [0, 0, 1, 1], [], []>} : vector<2x16xf32>, vector<16x32xf32>, vector<2x32xf32> -> vector<2x32xf32>
    %106 = vector.broadcast %16 : vector<1x32xf32> to vector<2x32xf32>
    %107 = arith.addf %106, %105 : vector<2x32xf32>
    %108 = math.exp %107 : vector<2x32xf32>
    %cst_26 = arith.constant 0.000000e+00 : f32
    %109 = vector.broadcast %cst_26 : f32 to vector<2x32xf32>
    %110 = arith.subf %109, %108 : vector<2x32xf32>
    %111 = math.exp %110 : vector<2x32xf32>
    %112 = tpu.concatenate %98, %90, %94, %102 in 0 : vector<2x32xf32>, vector<2x32xf32>, vector<2x32xf32>, vector<2x32xf32> -> vector<8x32xf32>
    %cst_27 = arith.constant dense<0.000000e+00> : vector<8x128xf32>
    %113 = tpu.matmul %112, %28, %cst_27 {dimension_numbers = #tpu.dot_dimension_numbers<[1], [0], [0], [1], [0, 0, 1, 1], [], []>} : vector<8x32xf32>, vector<32x128xf32>, vector<8x128xf32> -> vector<8x128xf32>
    %114 = vector.extract_strided_slice %113 {offsets = [0, 0], sizes = [2, 32], strides = [1, 1]} : vector<8x128xf32> to vector<2x32xf32>
    %115 = vector.extract_strided_slice %113 {offsets = [2, 32], sizes = [2, 32], strides = [1, 1]} : vector<8x128xf32> to vector<2x32xf32>
    %116 = vector.extract_strided_slice %113 {offsets = [4, 64], sizes = [2, 32], strides = [1, 1]} : vector<8x128xf32> to vector<2x32xf32>
    %117 = vector.extract_strided_slice %113 {offsets = [6, 96], sizes = [2, 32], strides = [1, 1]} : vector<8x128xf32> to vector<2x32xf32>
    %118 = arith.negf %117 : vector<2x32xf32>
    %119 = math.exp %118 : vector<2x32xf32>
    %cst_28 = arith.constant 1.000000e+00 : f32
    %120 = vector.broadcast %cst_28 : f32 to vector<2x32xf32>
    %121 = arith.addf %120, %119 : vector<2x32xf32>
    %122 = arith.divf %120, %121 : vector<2x32xf32>
    %123 = arith.mulf %117, %122 : vector<2x32xf32>
    %124 = tpu.concatenate %115, %114, %111 in 0 : vector<2x32xf32>, vector<2x32xf32>, vector<2x32xf32> -> vector<6x32xf32>
    %c0_29 = arith.constant 0 : index
    %c0_30 = arith.constant 0 : index
    %125 = vector.load %arg6[%c0_29, %c0_30] : memref<32x256xf32, #tpu.memory_space<vmem>>, vector<32x256xf32>
    %cst_31 = arith.constant dense<0.000000e+00> : vector<6x256xf32>
    %126 = tpu.matmul %124, %125, %cst_31 {dimension_numbers = #tpu.dot_dimension_numbers<[1], [0], [0], [1], [0, 0, 1, 1], [], []>} : vector<6x32xf32>, vector<32x256xf32>, vector<6x256xf32> -> vector<6x256xf32>
    %127 = vector.extract_strided_slice %126 {offsets = [0, 0], sizes = [2, 256], strides = [1, 1]} : vector<6x256xf32> to vector<2x256xf32>
    %128 = vector.extract_strided_slice %126 {offsets = [2, 0], sizes = [2, 256], strides = [1, 1]} : vector<6x256xf32> to vector<2x256xf32>
    %129 = vector.extract_strided_slice %126 {offsets = [4, 0], sizes = [2, 256], strides = [1, 1]} : vector<6x256xf32> to vector<2x256xf32>
    %130 = tpu.concatenate %116, %116, %116, %116, %116, %116, %116, %116 in 1 : vector<2x32xf32>, vector<2x32xf32>, vector<2x32xf32>, vector<2x32xf32>, vector<2x32xf32>, vector<2x32xf32>, vector<2x32xf32>, vector<2x32xf32> -> vector<2x256xf32>
    %131 = arith.mulf %127, %130 : vector<2x256xf32>
    %132 = arith.mulf %129, %39 : vector<2x256xf32>
    %133 = arith.addf %131, %132 : vector<2x256xf32>
    %134 = vector.broadcast %21 : vector<1x256xf32> to vector<2x256xf32>
    %135 = arith.mulf %134, %131 : vector<2x256xf32>
    %136 = arith.addf %135, %39 : vector<2x256xf32>
    %137 = arith.mulf %128, %136 : vector<2x256xf32>
    %c0_32 = arith.constant 0 : index
    %c0_33 = arith.constant 0 : index
    %138 = vector.load %arg7[%c0_32, %c0_33] : memref<256x32xf32, #tpu.memory_space<vmem>>, vector<256x32xf32>
    %cst_34 = arith.constant dense<0.000000e+00> : vector<2x32xf32>
    %139 = tpu.matmul %137, %138, %cst_34 {dimension_numbers = #tpu.dot_dimension_numbers<[1], [0], [0], [1], [0, 0, 1, 1], [], []>} : vector<2x256xf32>, vector<256x32xf32>, vector<2x32xf32> -> vector<2x32xf32>
    %140 = arith.mulf %139, %139 : vector<2x32xf32>
    %141 = tpu.concatenate %139, %140 in 0 : vector<2x32xf32>, vector<2x32xf32> -> vector<4x32xf32>
    %c0_35 = arith.constant 0 : index
    %c0_36 = arith.constant 0 : index
    %142 = vector.load %arg8[%c0_35, %c0_36] : memref<32x4xf32, #tpu.memory_space<vmem>>, vector<32x4xf32>
    %cst_37 = arith.constant dense<0.000000e+00> : vector<4x4xf32>
    %143 = tpu.matmul %141, %142, %cst_37 {dimension_numbers = #tpu.dot_dimension_numbers<[1], [0], [0], [1], [0, 0, 1, 1], [], []>} : vector<4x32xf32>, vector<32x4xf32>, vector<4x4xf32> -> vector<4x4xf32>
    %cst_38 = arith.constant 1.250000e-01 : f32
    %144 = vector.broadcast %cst_38 : f32 to vector<4x4xf32>
    %145 = arith.mulf %143, %144 : vector<4x4xf32>
    %c0_39 = arith.constant 0 : index
    %c0_40 = arith.constant 0 : index
    %146 = vector.load %arg9[%c0_39, %c0_40] : memref<4x32xf32, #tpu.memory_space<vmem>>, vector<4x32xf32>
    %cst_41 = arith.constant dense<0.000000e+00> : vector<4x32xf32>
    %147 = tpu.matmul %145, %146, %cst_41 {dimension_numbers = #tpu.dot_dimension_numbers<[1], [0], [0], [1], [0, 0, 1, 1], [], []>} : vector<4x4xf32>, vector<4x32xf32>, vector<4x32xf32> -> vector<4x32xf32>
    %148 = vector.extract_strided_slice %147 {offsets = [0, 0], sizes = [2, 32], strides = [1, 1]} : vector<4x32xf32> to vector<2x32xf32>
    %149 = vector.extract_strided_slice %147 {offsets = [2, 0], sizes = [2, 32], strides = [1, 1]} : vector<4x32xf32> to vector<2x32xf32>
    %150 = arith.mulf %148, %148 : vector<2x32xf32>
    %151 = arith.subf %149, %150 : vector<2x32xf32>
    %152 = arith.subf %139, %148 : vector<2x32xf32>
    %cst_42 = arith.constant 9.99999974E-6 : f32
    %153 = vector.broadcast %cst_42 : f32 to vector<2x32xf32>
    %154 = arith.addf %151, %153 : vector<2x32xf32>
    %155 = math.rsqrt %154 : vector<2x32xf32>
    %156 = arith.mulf %152, %155 : vector<2x32xf32>
    %157 = vector.broadcast %17 : vector<1x32xf32> to vector<2x32xf32>
    %158 = arith.mulf %156, %157 : vector<2x32xf32>
    %159 = vector.broadcast %18 : vector<1x32xf32> to vector<2x32xf32>
    %160 = arith.addf %158, %159 : vector<2x32xf32>
    %161 = arith.mulf %160, %123 : vector<2x32xf32>
    %cst_43 = arith.constant dense<0.000000e+00> : vector<2x32xf32>
    %162 = tpu.matmul %161, %29, %cst_43 {dimension_numbers = #tpu.dot_dimension_numbers<[1], [0], [0], [1], [0, 0, 1, 1], [], []>} : vector<2x32xf32>, vector<32x32xf32>, vector<2x32xf32> -> vector<2x32xf32>
    %163 = arith.addf %3, %162 : vector<2x32xf32>
    %cst_44 = arith.constant dense<0.000000e+00> : vector<2xf32>
    %164 = vector.multi_reduction <add>, %163, %cst_44 [1] : vector<2x32xf32> to vector<2xf32>
    %165 = vector.shape_cast %164 : vector<2xf32> to vector<2x1xf32>
    %cst_45 = arith.constant 3.200000e+01 : f32
    %166 = vector.broadcast %cst_45 : f32 to vector<2x1xf32>
    %167 = arith.divf %165, %166 : vector<2x1xf32>
    %168 = vector.broadcast %167 : vector<2x1xf32> to vector<2x32xf32>
    %169 = arith.subf %163, %168 : vector<2x32xf32>
    %170 = arith.mulf %169, %169 : vector<2x32xf32>
    %cst_46 = arith.constant dense<0.000000e+00> : vector<2xf32>
    %171 = vector.multi_reduction <add>, %170, %cst_46 [1] : vector<2x32xf32> to vector<2xf32>
    %172 = vector.shape_cast %171 : vector<2xf32> to vector<2x1xf32>
    %cst_47 = arith.constant 3.200000e+01 : f32
    %173 = vector.broadcast %cst_47 : f32 to vector<2x1xf32>
    %174 = arith.divf %172, %173 : vector<2x1xf32>
    %175 = vector.broadcast %167 : vector<2x1xf32> to vector<2x32xf32>
    %176 = arith.subf %163, %175 : vector<2x32xf32>
    %cst_48 = arith.constant 9.99999974E-6 : f32
    %177 = vector.broadcast %cst_48 : f32 to vector<2x1xf32>
    %178 = arith.addf %174, %177 : vector<2x1xf32>
    %179 = math.rsqrt %178 : vector<2x1xf32>
    %180 = vector.broadcast %179 : vector<2x1xf32> to vector<2x32xf32>
    %181 = arith.mulf %176, %180 : vector<2x32xf32>
    %182 = vector.broadcast %8 : vector<1x32xf32> to vector<2x32xf32>
    %183 = arith.mulf %181, %182 : vector<2x32xf32>
    %184 = vector.broadcast %9 : vector<1x32xf32> to vector<2x32xf32>
    %185 = arith.addf %183, %184 : vector<2x32xf32>
    %186 = arith.subf %37, %185 : vector<2x32xf32>
    %187 = vector.broadcast %19 : vector<1x32xf32> to vector<2x32xf32>
    %188 = arith.mulf %186, %187 : vector<2x32xf32>
    %189 = arith.addf %185, %188 : vector<2x32xf32>
    %190 = vector.broadcast %20 : vector<1x32xf32> to vector<2x32xf32>
    %191 = arith.mulf %186, %190 : vector<2x32xf32>
    %192 = arith.addf %185, %191 : vector<2x32xf32>
    %193 = tpu.concatenate %192, %189 in 0 : vector<2x32xf32>, vector<2x32xf32> -> vector<4x32xf32>
    %cst_49 = arith.constant dense<0.000000e+00> : vector<4x64xf32>
    %194 = tpu.matmul %193, %30, %cst_49 {dimension_numbers = #tpu.dot_dimension_numbers<[1], [0], [0], [1], [0, 0, 1, 1], [], []>} : vector<4x32xf32>, vector<32x64xf32>, vector<4x64xf32> -> vector<4x64xf32>
    %195 = vector.extract_strided_slice %194 {offsets = [0, 0], sizes = [2, 32], strides = [1, 1]} : vector<4x64xf32> to vector<2x32xf32>
    %196 = arith.negf %195 : vector<2x32xf32>
    %197 = math.exp %196 : vector<2x32xf32>
    %cst_50 = arith.constant 1.000000e+00 : f32
    %198 = vector.broadcast %cst_50 : f32 to vector<2x32xf32>
    %199 = arith.addf %198, %197 : vector<2x32xf32>
    %200 = arith.divf %198, %199 : vector<2x32xf32>
    %201 = vector.extract_strided_slice %194 {offsets = [2, 32], sizes = [2, 32], strides = [1, 1]} : vector<4x64xf32> to vector<2x32xf32>
    %cst_51 = arith.constant 0.000000e+00 : f32
    %202 = vector.broadcast %cst_51 : f32 to vector<2x32xf32>
    %203 = arith.maximumf %201, %202 : vector<2x32xf32>
    %204 = arith.mulf %203, %203 : vector<2x32xf32>
    %cst_52 = arith.constant dense<0.000000e+00> : vector<2x32xf32>
    %205 = tpu.matmul %204, %31, %cst_52 {dimension_numbers = #tpu.dot_dimension_numbers<[1], [0], [0], [1], [0, 0, 1, 1], [], []>} : vector<2x32xf32>, vector<32x32xf32>, vector<2x32xf32> -> vector<2x32xf32>
    %206 = arith.mulf %200, %205 : vector<2x32xf32>
    %207 = arith.addf %163, %206 : vector<2x32xf32>
    %c0_53 = arith.constant 0 : index
    %c0_54 = arith.constant 0 : index
    %208 = vector.load %arg14[%c0_53, %c0_54] : memref<2x32xf32, #tpu.memory_space<vmem>>, vector<2x32xf32>
    tpu.vector_store %arg14[%c0_53, %c0_54], %207 {strides = array<i32>} : memref<2x32xf32, #tpu.memory_space<vmem>>, vector<2x32xf32>,
    %cst_55 = arith.constant 0.000000e+00 : f32
    %209 = vector.broadcast %cst_55 : f32 to vector<2x64xf32>
    %210 = tpu.concatenate %185, %61, %133, %209 in 1 : vector<2x32xf32>, vector<2x32xf32>, vector<2x256xf32>, vector<2x64xf32> -> vector<2x384xf32>
    %c0_56 = arith.constant 0 : index
    %c0_57 = arith.constant 0 : index
    %c0_58 = arith.constant 0 : index
    %211 = vector.load %arg13[%c0_56, %c0_57, %c0_58] : memref<1x2x384xf32, #tpu.memory_space<vmem>>, vector<1x2x384xf32>
    %212 = vector.shape_cast %211 : vector<1x2x384xf32> to vector<2x384xf32>
    %213 = vector.shape_cast %210 : vector<2x384xf32> to vector<1x2x384xf32>
    tpu.vector_store %arg13[%c0_56, %c0_57, %c0_58], %213 {strides = array<i32>} : memref<1x2x384xf32, #tpu.memory_space<vmem>>, vector<1x2x384xf32>,
    %c1_i32 = arith.constant 1 : i32
    %214 = arith.cmpi eq, %arg0, %c1_i32 : i32
    %215 = arith.extui %214 : i1 to i32
    %c0_i32_59 = arith.constant 0 : i32
    %216 = arith.cmpi ne, %215, %c0_i32_59 : i32
    scf.if %216 {
      %c0_60 = arith.constant 0 : index
      %c0_61 = arith.constant 0 : index
      %217 = vector.load %arg10[%c0_60, %c0_61] : memref<4x32xf32, #tpu.memory_space<vmem>>, vector<4x32xf32>
      %218 = vector.extract_strided_slice %217 {offsets = [2, 0], sizes = [1, 32], strides = [1, 1]} : vector<4x32xf32> to vector<1x32xf32>
      %219 = vector.extract_strided_slice %217 {offsets = [3, 0], sizes = [1, 32], strides = [1, 1]} : vector<4x32xf32> to vector<1x32xf32>
      %cst_62 = arith.constant dense<0.000000e+00> : vector<2xf32>
      %220 = vector.multi_reduction <add>, %207, %cst_62 [1] : vector<2x32xf32> to vector<2xf32>
      %221 = vector.shape_cast %220 : vector<2xf32> to vector<2x1xf32>
      %cst_63 = arith.constant 3.200000e+01 : f32
      %222 = vector.broadcast %cst_63 : f32 to vector<2x1xf32>
      %223 = arith.divf %221, %222 : vector<2x1xf32>
      %224 = vector.broadcast %223 : vector<2x1xf32> to vector<2x32xf32>
      %225 = arith.subf %207, %224 : vector<2x32xf32>
      %226 = arith.mulf %225, %225 : vector<2x32xf32>
      %cst_64 = arith.constant dense<0.000000e+00> : vector<2xf32>
      %227 = vector.multi_reduction <add>, %226, %cst_64 [1] : vector<2x32xf32> to vector<2xf32>
      %228 = vector.shape_cast %227 : vector<2xf32> to vector<2x1xf32>
      %cst_65 = arith.constant 3.200000e+01 : f32
      %229 = vector.broadcast %cst_65 : f32 to vector<2x1xf32>
      %230 = arith.divf %228, %229 : vector<2x1xf32>
      %231 = vector.broadcast %223 : vector<2x1xf32> to vector<2x32xf32>
      %232 = arith.subf %207, %231 : vector<2x32xf32>
      %cst_66 = arith.constant 9.99999974E-6 : f32
      %233 = vector.broadcast %cst_66 : f32 to vector<2x1xf32>
      %234 = arith.addf %230, %233 : vector<2x1xf32>
      %235 = math.rsqrt %234 : vector<2x1xf32>
      %236 = vector.broadcast %235 : vector<2x1xf32> to vector<2x32xf32>
      %237 = arith.mulf %232, %236 : vector<2x32xf32>
      %238 = vector.broadcast %218 : vector<1x32xf32> to vector<2x32xf32>
      %239 = arith.mulf %237, %238 : vector<2x32xf32>
      %240 = vector.broadcast %219 : vector<1x32xf32> to vector<2x32xf32>
      %241 = arith.addf %239, %240 : vector<2x32xf32>
      %c0_67 = arith.constant 0 : index
      %c0_68 = arith.constant 0 : index
      %242 = vector.load %arg11[%c0_67, %c0_68] : memref<32x128xbf16, #tpu.memory_space<vmem>>, vector<32x128xbf16>
      %243 = arith.extf %242 : vector<32x128xbf16> to vector<32x128xf32>
      %cst_69 = arith.constant dense<0.000000e+00> : vector<2x128xf32>
      %244 = tpu.matmul %241, %243, %cst_69 {dimension_numbers = #tpu.dot_dimension_numbers<[1], [0], [0], [1], [0, 0, 1, 1], [], []>} : vector<2x32xf32>, vector<32x128xf32>, vector<2x128xf32> -> vector<2x128xf32>
      %c0_70 = arith.constant 0 : index
      %c0_71 = arith.constant 0 : index
      %245 = vector.load %arg12[%c0_70, %c0_71] : memref<2x128xf32, #tpu.memory_space<vmem>>, vector<2x128xf32>
      tpu.vector_store %arg12[%c0_70, %c0_71], %244 {strides = array<i32>} : memref<2x128xf32, #tpu.memory_space<vmem>>, vector<2x128xf32>,
    } else {
    }
    return
  }
  func.func @transform_0(%arg0: i32) -> (i32, i32) {
    %c0_i32 = arith.constant 0 : i32
    %c0_i32_0 = arith.constant 0 : i32
    %c0_i32_1 = arith.constant 0 : i32
    return %c0_i32, %c0_i32_0 : i32, i32
  }
  func.func @transform_1(%arg0: i32) -> (i32, i32, i32) {
    %c0_i32 = arith.constant 0 : i32
    %c0_i32_0 = arith.constant 0 : i32
    %c0_i32_1 = arith.constant 0 : i32
    return %arg0, %c0_i32, %c0_i32_0 : i32, i32, i32
  }
  func.func @transform_2(%arg0: i32) -> (i32, i32, i32) {
    %c0_i32 = arith.constant 0 : i32
    %c0_i32_0 = arith.constant 0 : i32
    %c0_i32_1 = arith.constant 0 : i32
    return %arg0, %c0_i32, %c0_i32_0 : i32, i32, i32
  }
  func.func @transform_3(%arg0: i32) -> (i32, i32, i32) {
    %c0_i32 = arith.constant 0 : i32
    %c0_i32_0 = arith.constant 0 : i32
    %c0_i32_1 = arith.constant 0 : i32
    return %arg0, %c0_i32, %c0_i32_0 : i32, i32, i32
  }
  func.func @transform_4(%arg0: i32) -> (i32, i32, i32) {
    %c0_i32 = arith.constant 0 : i32
    %c0_i32_0 = arith.constant 0 : i32
    %c0_i32_1 = arith.constant 0 : i32
    return %arg0, %c0_i32, %c0_i32_0 : i32, i32, i32
  }
  func.func @transform_5(%arg0: i32) -> (i32, i32) {
    %c0_i32 = arith.constant 0 : i32
    %c0_i32_0 = arith.constant 0 : i32
    %c0_i32_1 = arith.constant 0 : i32
    return %c0_i32, %c0_i32_0 : i32, i32
  }
  func.func @transform_6(%arg0: i32) -> (i32, i32) {
    %c0_i32 = arith.constant 0 : i32
    %c0_i32_0 = arith.constant 0 : i32
    %c0_i32_1 = arith.constant 0 : i32
    return %c0_i32, %c0_i32_0 : i32, i32
  }
  func.func @transform_7(%arg0: i32) -> (i32, i32) {
    %c0_i32 = arith.constant 0 : i32
    %c0_i32_0 = arith.constant 0 : i32
    %c0_i32_1 = arith.constant 0 : i32
    return %c0_i32, %c0_i32_0 : i32, i32
  }
  func.func @transform_8(%arg0: i32) -> (i32, i32) {
    %c0_i32 = arith.constant 0 : i32
    %c0_i32_0 = arith.constant 0 : i32
    %c0_i32_1 = arith.constant 0 : i32
    return %c0_i32, %c0_i32_0 : i32, i32
  }
  func.func @transform_9(%arg0: i32) -> (i32, i32) {
    %c0_i32 = arith.constant 0 : i32
    %c0_i32_0 = arith.constant 0 : i32
    %c0_i32_1 = arith.constant 0 : i32
    return %c0_i32, %c0_i32_0 : i32, i32
  }
  func.func @transform_10(%arg0: i32) -> (i32, i32) {
    %c0_i32 = arith.constant 0 : i32
    %c0_i32_0 = arith.constant 0 : i32
    %c0_i32_1 = arith.constant 0 : i32
    return %c0_i32, %c0_i32_0 : i32, i32
  }
  func.func @transform_11(%arg0: i32) -> (i32, i32) {
    %c0_i32 = arith.constant 0 : i32
    %c0_i32_0 = arith.constant 0 : i32
    %c0_i32_1 = arith.constant 0 : i32
    return %c0_i32, %c0_i32_0 : i32, i32
  }
  func.func @transform_12(%arg0: i32) -> (i32, i32, i32) {
    %c0_i32 = arith.constant 0 : i32
    %c0_i32_0 = arith.constant 0 : i32
    %c0_i32_1 = arith.constant 0 : i32
    return %arg0, %c0_i32, %c0_i32_0 : i32, i32, i32
  }
}

</mosaic_0001>

<bundles_post_ra>
// kernel: rwkv_forward.1
= control target key start
LH: loop header
LB: loop body
LE: loop exit
PB: predicated region body
PF: predicated region fallthrough
CT: control target
= control target key end

     0   :  { %s3845_s0 = inlined_call_operand.vmem [shape: f32[2,32], index: 0, kind: input, shape index: {}]   ;;  %s3846_s1 = inlined_call_operand.vmem [shape: f32[2,2,384], index: 1, kind: input, shape index: {}]   ;;  %s3847_s2 = inlined_call_operand.vmem [shape: bf16[2,32,384], index: 2, kind: input, shape index: {}]   ;;  %s3848_s3 = inlined_call_operand.vmem [shape: bf16[2,16,256], index: 3, kind: input, shape index: {}]   ;;  %s3849_s4 = inlined_call_operand.vmem [shape: f32[2,16,256], index: 4, kind: input, shape index: {}]   ;;  %s3850_s5 = inlined_call_operand.vmem [shape: f32[32,256], index: 5, kind: input, shape index: {}]   ;;  %s3851_s6 = inlined_call_operand.vmem [shape: f32[256,32], index: 6, kind: input, shape index: {}]   ;;  %s3852_s7 = inlined_call_operand.vmem [shape: f32[32,4], index: 7, kind: input, shape index: {}]   ;;  %s3853_s8 = inlined_call_operand.vmem [shape: f32[4,32], index: 8, kind: input, shape index: {}]   ;;  %s3854_s9 = inlined_call_operand.vmem [shape: f32[4,32], index: 9, kind: input, shape index: {}]   ;;  %s3855_s10 = inlined_call_operand.vmem [shape: bf16[32,128], index: 10, kind: input, shape index: {}]   ;;  %s3856_s11 = inlined_call_operand.hbm [shape: f32[2,128], index: 11, kind: output, shape index: {0}]   ;;  %s3857_s12 = inlined_call_operand.hbm [shape: f32[2,2,384], index: 12, kind: output, shape index: {1}]  }
   0x1   :  { %3870 = sst [smem:[#allocation17_spill]] %s3856_s11 }
   0x2   :  { %3871 = sst [smem:[#allocation18_spill]] %s3857_s12 }
   0x3   :  { %18 = vsyncpa [#allocation4], 0 }
   0x4   :  { %19 = vsyncpa [#allocation6], 0 }
   0x5   :  { %21 = vsyncpa [#allocation6 + $0x1], 0  ;;  %s3196_s21 = smov 0   ;;  %s3198_s22 = smov 0  }
   0x6   :  { %s3200_s23 = smov 0   ;;  %s3202_s24 = smov 0  }
   0x7 LB: > { %3872 = sst [smem:[#allocation9_spill]] %s3101_s21  ;;  %s3217_s25 = sadd.s32 4294967295, %s3113_s24   ;;  %s3113_s24 = sphi %s3202_s24, %s3890_s24   ;;  %s3109_s23 = sphi %s3200_s23, %s3893_s23   ;;  %s3105_s22 = sphi %s3198_s22, %s3892_s22   ;;  %s3101_s21 = sphi %s3196_s21, %s3891_s21  }
   0x8   : > { %3873 = sst [smem:[#allocation10_spill]] %s3105_s22  ;;  %s2533_s26 = sadd.s32 4294967294, %s3113_s24  }
   0x9   : > { %3874 = sst [smem:[#allocation11_spill]] %s3109_s23  ;;  %s3221_s27 = sadd.s32 1, %s3113_s24  }
   0xa   : > { %3875 = sst [smem:[#allocation12_spill]] %s3113_s24  ;;  %s306_s28 = sadd.s32 1, %s3109_s23 }
   0xb   : > { %3876 = sst [smem:[#allocation13_spill]] %s3221_s27  ;;  %s303_s29 = ssub.s32 %s3113_s24, %s3221_s27 }
   0xc   : > { %p316_p0 = scmp.ne.s32.totalorder %s3109_s23, %s3105_s22  ;;  %p304_p1 = scmp.eq.s32.totalorder %s303_s29, 0 }
   0xd   : > { %p317_p2 = scmp.eq.s32.totalorder %s3217_s25, 1  ;;  %p322_p3 = scmp.ne.s32.totalorder %s3105_s22, %s3101_s21 }
   0xe   : > { %p323_p4 = scmp.eq.s32.totalorder %s2533_s26, 1  ;;  %p2536_p7 = scmp.ge.s32.totalorder %s3113_s24, 1 }
   0xf   : > { %s3232_s30 = scalar_select %p304_p1, %s3109_s23, %s306_s28  }
  0x10   : > { %p3236_p5 = por %p317_p2, %p316_p0  ;;  %p3240_p6 = por %p323_p4, %p322_p3 }
  0x11   : > { %3877 = sst [smem:[#allocation14_spill]] %s3232_s30  ;;  %p394_p8 = scmp.lt.s32.totalorder %s3113_s24, 3 }
  0x12   : > { %s3878_s13 = scalar_select %p3236_p5, 1, 0 }
  0x13   : > { %s3880_s14 = scalar_select %p3240_p6, 1, 0 }
  0x14   : > { %3879 = sst [smem:[#allocation15_spill]] %s3878_s13  ;;  %p395_p9 = pnand %p2536_p7, %p394_p8 }
  0x15   : > { %3881 = sst [smem:[#allocation16_spill]] %s3880_s14  ;;  %s3864_s15 = sand.u32 (!%p395_p9), 1, %s3105_s22  }
  0x16   : > { %398 = sbr.rel (%p395_p9) target bundleno = 4847 (0x12ef), region = 64  ;;  %p451_p10 = scmp.lt.s32.totalorder (!%p395_p9), %s3217_s25, 1 }
  0x17   : > { %s3250_s16 = smul.u32 (!%p395_p9), 6, %s3864_s15  ;;  %p2543_p11 = scmp.ne.s32.totalorder (!%p395_p9), %s3217_s25, 0 }
  0x19   : > { %s450_s11 = scalar_lea.vmem (!%p395_p9), [#allocation5], %s3250_s16 }
  0x1d   : > { %s452_s17 = scalar_select %p451_p10, %s3217_s25, 1 }
  0x1e   : > { %474 = sbr.rel (%p2543_p11) target bundleno = 345 (0x159), region = 68  ;;  %v476_v0 = vld [vmem:[%s3845_s0] sm:$0x3] (!%p2543_p11)  ;;  %vm477_vm0 = vcmask (!%p2543_p11), 254976   ;;  %v492_v9 = vlaneseq (!%p2543_p11) }
  0x1f   : > { %s2894_s18 = smul.u32 6, %s452_s17  ;;  %s2569_s19 = sshll.u32 %s452_s17, 4  ;;  %v478_v1 = vsel (!%p2543_p11), %vm477_vm0, %v476_v0, 0.0  ;;  %v475_v13 = vld [vmem:[%s3854_s9] sm:$0xf] (!%p2543_p11) }
  0x20   : > { %s2895_s20 = smul.u32 48, %s452_s17  ;;  %s3256_s29 = scalar_lea.vmem %s3848_s3, %s2569_s19  ;;  %479 = vadd.xlane.f32.xlu0 (!%p2543_p11), %v478_v1  ;;  %v493_v11 = vshrl.u32 (!%p2543_p11), %v492_v9, 7 }
  0x21   : > { %s3261_s27 = scalar_lea.vmem %s3846_s1, %s2894_s18  ;;  %s2570_s14 = sshll.u32 %s452_s17, 5 }
  0x22   : > { %s3266_s15 = scalar_lea.vmem %s3847_s2, %s2895_s20  ;;  %s3271_s22 = scalar_lea.vmem %s3849_s4, %s2570_s14  ;;  %v494_v12 = vsub.s32 (!%p2543_p11), 0, %v493_v11  ;;  %v499_v14 = vsub.s32 (!%p2543_p11), 1, %v493_v11 }
  0x24   : > { %v495_v15 = vrot.slane (!%p2543_p11), %v475_v13, %v494_v12  ;;  %v500_v18 = vrot.slane (!%p2543_p11), %v475_v13, %v499_v14 }
  0xad   : > { %v480_v2 = vpop.xlane.xlu0 %479 }
  0xae   : > { %v482_v3 = vmul.f32 0.03125, %v480_v2 }
  0xb0   : > { %v483_v4 = vsub.f32 %v476_v0, %v482_v3 }
  0xb2   : > { %v484_v5 = vmul.f32 %v483_v4, %v483_v4 }
  0xb4   : > { %v485_v6 = vsel %vm477_vm0, %v484_v5, 0.0 }
  0xb5   : > { %486 = vadd.xlane.f32.xlu0 %v485_v6 }
 0x142   : > { %v487_v7 = vpop.xlane.xlu0 %486 }
 0x143   : > { %v488_v8 = vmul.f32 0.03125, %v487_v7 }
 0x145   : > { %v489_v10 = vadd.f32 1e-05, %v488_v8 }
 0x147   : > { %2957 = vrsqrt.f32 %v489_v10 }
 0x151   : > { %v2958_v16 = vpop.eup %2957 }
 0x152   : > { %v491_v17 = vmul.f32 %v2958_v16, %v483_v4 }
 0x154   : > { %v496_v19 = vmul.f32 %v495_v15, %v491_v17 }
 0x156   : > { %v501_v20 = vadd.f32 %v500_v18, %v496_v19 }
 0x158   : > { %502 = vst.msk [vmem:[#allocation2] sm:$0x3] %vm477_vm0, %v501_v20 }
 0x159 PF: > { %vm533_vm1 = vcmask 254976   ;;  %v548_v30 = vlaneseq  ;;  %v3115_v34 = vmov 1983009808   ;;  %v3294_v36 = vld [vmem:[%s3271_s22] sm:$0xff]  ;;  %v3308_v46 = vld [vmem:[%s3266_s15 + $0x8] sm:$0xf] }
 0x15a   : > { %v560_v35 = vunpack.c.l.s4 %v3115_v34  ;;  %v3311_v47 = vld [vmem:[%s3266_s15 + $0x14] sm:$0xf]  ;;  %v3116_v50 = vmov 0.0|0.0   ;;  %v3322_v52 = vld [vmem:[%s3266_s15 + $0x20] sm:$0xf]  ;;  %s3117_s23 = smov 32   ;;  %v517_v10 = vunpack.c.l.bf16 %v3308_v46 }
 0x15b   : > { %v3290_v32 = vshrl.u32 %v548_v30, 7  ;;  %2795 = vmatprep.subr.bf16.mxu0 %v3116_v50  ;;  %v2886_v51 = vcombine.low %v3308_v46, %v3311_v47  ;;  %v3325_v53 = vld [vmem:[%s3266_s15 + $0x2c] sm:$0xf]  ;;  %vm3118_vm2 = vmmov 0   ;;  %v3119_v57 = vmov 0.0   ;;  %v3340_v58 = vld [vmem:[%s3256_s29] sm:$0xff] }
 0x15c   : > { %v561_v39 = vunpack.c.0.s8 %v560_v35  ;;  %v2887_v55 = vcombine.low %v3322_v52, %v3325_v53  ;;  %2678 = vmatprep.mubr.msk.f32.mxu0 %vm3118_vm2, %v3119_v57  ;;  %2681 = vmatprep.subr.mxu1 %v3119_v57  ;;  %v529_v59 = vunpack.c.l.bf16 %v3340_v58  ;;  %v3346_v60 = vld [vmem:[%s3261_s27] sm:$0x3f]  ;;  %s3120_s24 = smov 96   ;;  %vm598_vm3 = vcmask 261120   ;;  %s3121_s27 = smov 64  }
 0x15d   : > { %v550_v33 = vsub.s32 0, %v3290_v32  ;;  %v555_v37 = vsub.s32 1, %v3290_v32  ;;  %v572_v43 = vsub.s32 4, %v3290_v32  ;;  %2797 = vmatpush3.bf16.msra.mxu0 %v2886_v51  ;;  %2683 = vmatprep.mubr.msk.f32.mxu1 %vm3118_vm2, %v3119_v57  ;;  %v530_v5 = vunpack.c.h.bf16 %v3340_v58  ;;  %s3122_s30 = smov 120   ;;  %s3123_s13 = smov 112  }
 0x15e   : > { %v3305_v44 = vsub.s32 %v561_v39, %v3290_v32  ;;  %2798 = vmatprep.subr.bf16.mxu0 %v3116_v50  ;;  %vm677_vm4 = vcmask 64512   ;;  %s3124_s14 = smov 104   ;;  %v520_v11 = vunpack.c.l.bf16 %v3311_v47  ;;  %s3125_s17 = smov 88   ;;  %v1059_v19 = vsub.s32 5, %v3290_v32 }
 0x15f   : > { %v3284_v21 = vld [vmem:[#allocation2] sm:$0x3]  ;;  %v551_v38 = vrot.slane %v3294_v36, %v550_v33  ;;  %v556_v41 = vrot.slane %v3294_v36, %v555_v37  ;;  %v573_v49 = vrot.slane %v3294_v36, %v572_v43  ;;  %v1088_v35 = vsub.s32 6, %v3290_v32  ;;  %p2562_p12 = scmp.ne.s32.totalorder %s3217_s25, 1 }
 0x160   : > { %v534_v22 = vsel %vm533_vm1, %v3284_v21, 0.0  ;;  %v2959_v12 = vpack.i.bf16 %v520_v11, %v517_v10  ;;  %v1060_v20 = vrot.slane %v3294_v36, %v1059_v19  ;;  %v3402_v39 = vsub.s32 7, %v3290_v32 }
 0x161   : > { %535 = vadd.xlane.f32.xlu0 %v534_v22  ;;  %v581_v56 = vrot.slane %v573_v49, %v3305_v44  ;;  %2800 = vmatpush3.bf16.msra.mxu0 %v2887_v55  ;;  %vm1292_vm5 = vcmask 130048   ;;  %vm1385_vm6 = vcmask 1041408   ;;  %vm1387_vm7 = vcmask 1043456  }
 0x162   : > { %2801 = vmatprep.subr.bf16.mxu0 %v3116_v50  ;;  %v1118_v47 = vrot.slane %v3294_v36, %v3402_v39  ;;  %vm1389_vm8 = vcmask 1045504   ;;  %vm1579_vm9 = vcmask 523264   ;;  %vm1581_vm10 = vcmask 785408  }
 0x163   : > { %vm1847_vm11 = vcmask 31744   ;;  %vm3127_vm12 = vmmov (!%p2562_p12), 0  }
 0x1ee   : > { %v536_v23 = vpop.xlane.xlu0 %535 }
 0x1ef   : > { %v538_v24 = vmul.f32 0.03125, %v536_v23 }
 0x1f1   : > { %v539_v25 = vsub.f32 %v3284_v21, %v538_v24 }
 0x1f3   : > { %v540_v26 = vmul.f32 %v539_v25, %v539_v25 }
 0x1f5   : > { %v541_v27 = vsel %vm533_vm1, %v540_v26, 0.0  ;;  %v526_v26 = vunpack.c.l.bf16 %v3325_v53 }
 0x1f6   : > { %542 = vadd.xlane.f32.xlu0 %v541_v27 }
 0x283   : > { %v543_v28 = vpop.xlane.xlu0 %542 }
 0x284   : > { %v544_v29 = vmul.f32 0.03125, %v543_v28 }
 0x286   : > { %v545_v31 = vadd.f32 1e-05, %v544_v29 }
 0x288   : > { %2997 = vrsqrt.f32 %v545_v31 }
 0x292   : > { %v2998_v40 = vpop.eup %2997 }
 0x293   : > { %v547_v42 = vmul.f32 %v2998_v40, %v539_v25  ;;  %v523_v25 = vunpack.c.l.bf16 %v3322_v52 }
 0x295   : > { %v552_v45 = vmul.f32 %v551_v38, %v547_v42  ;;  %v2964_v29 = vpack.i.bf16 %v526_v26, %v523_v25  ;;  %v1089_v38 = vrot.slane %v3294_v36, %v1088_v35  ;;  %v528_v25 = vld [vmem:[%s3256_s29 + $0x8] sm:$0xff] }
 0x296   : > { %v2888_v26 = vcombine.low %v3340_v58, %v528_v25 }
 0x297   : > { %v3313_v48 = vadd.f32 %v556_v41, %v552_v45  ;;  %v3405_v45 = vld [vmem:[%s3271_s22 + $0x10] sm:$0xff] }
 0x299   : > { %v565_v54 = vrot.slane %v3313_v48, %v3305_v44 }
 0x29b   : > { %566 = vrot.lane.b32.xlu1 %v565_v54, %s3117_s23  ;;  %v1147_v54 = vrot.slane %v3405_v45, %v550_v33 }
 0x29f   : > { %582 = vrot.lane.b32.xlu1 %v581_v56, %s3117_s23 }
 0x2a3   : > { %674 = vrot.lane.b32.xlu1 %v529_v59, %s3120_s24 }
 0x2a7   : > { %753 = vrot.lane.b32.xlu1 %v529_v59, %s3121_s27 }
 0x2ab   : > { %830 = vrot.lane.b32.xlu1 %v529_v59, %s3117_s23 }
 0x30d   : > { %v567_v61 = vpop.permute.xlu1 %566 }
 0x30e   : > { %v3350_v62 = vsub.f32 %v3346_v60, %v567_v61 }
 0x311   : > { %v583_v63 = vpop.permute.xlu1 %582 }
 0x312   : > { %v585_v0 = vmul.f32 %v583_v63, %v3350_v62 }
 0x314   : > { %v593_v1 = vrot.slane %v585_v0, %v3305_v44 }
 0x315   : > { %v675_v4 = vpop.permute.xlu1 %674 }
 0x316   : > { %594 = vrot.lane.b32.xlu0 %v593_v1, %s3120_s24  ;;  %2682 = vmatpush3.msra.mxu1 %v675_v4  ;;  %v1176_v1 = vrot.slane %v3405_v45, %v555_v37 }
 0x317   : > { %2686 = vmatprep.subr.mxu1 %v3119_v57 }
 0x319   : > { %v754_v9 = vpop.permute.xlu1 %753 }
 0x31a   : > { %982 = vrot.lane.b32.xlu0 %v530_v5, %s3120_s24 }
 0x31d   : > { %v831_v13 = vpop.permute.xlu1 %830 }
 0x388   : > { %v595_v2 = vpop.permute.xlu0 %594 }
 0x389   : > { %v597_v3 = vadd.f32 %v595_v2, %v3313_v48 }
 0x38b   : > { %2679 = vmatmul.mubr.msk.f32.vlgmr.msra.gmra.mrb[0].mxu0 %vm598_vm3, %v597_v3 }
 0x38c   : > { %2714 = vmatprep.mubr.msk.f32.mxu0 %vm3118_vm2, %v3119_v57  ;;  %v983_v16 = vpop.permute.xlu0 %982 }
 0x45e   : > { %v668_v6 = vpop.f32.mrb[0].mxu0 }
 0x45f   : > { %2999 = vtanh.f32 %v668_v6  ;;  %v2680_v7 = vpop.f32.mrb[1].mxu0 }
 0x469   : > { %v3000_v8 = vpop.eup %2999 }
 0x46a   : > { %751 = vrot.lane.b32.xlu1 %v3000_v8, %s3122_s30  ;;  %2684 = vmatmul.mubr.msk.f32.vlgmr.msra.gmra.mrb[0].mxu1 %vm677_vm4, %v3000_v8 }
 0x46b   : > { %2687 = vmatpush3.msra.mxu1 %v754_v9  ;;  %2688 = vmatprep.mubr.msk.f32.mxu1 %vm3118_vm2, %v3119_v57 }
 0x46c   : > { %2691 = vmatprep.subr.mxu1 %v3119_v57 }
 0x46e   : > { %828 = vrot.lane.b32.xlu1 %v3000_v8, %s3123_s13 }
 0x472   : > { %905 = vrot.lane.b32.xlu1 %v3000_v8, %s3124_s14 }
 0x476   : > { %979 = vrot.lane.b32.xlu1 %v3000_v8, %s3120_s24 }
 0x47a   : > { %2960 = vrot.lane.b32.xlu1 %v2959_v12, %s3125_s17 }
 0x4dc   : > { %v752_v14 = vpop.permute.xlu1 %751 }
 0x4dd   : > { %2689 = vmatmul.mubr.msk.f32.vlgmr.msra.gmra.mrb[2].mxu1 %vm677_vm4, %v752_v14 }
 0x4de   : > { %2692 = vmatpush3.msra.mxu1 %v831_v13  ;;  %2693 = vmatprep.mubr.msk.f32.mxu1 %vm3118_vm2, %v3119_v57 }
 0x4df   : > { %2696 = vmatprep.subr.mxu1 %v3119_v57 }
 0x4e0   : > { %v829_v15 = vpop.permute.xlu1 %828 }
 0x4e1   : > { %2694 = vmatmul.mubr.msk.f32.vlgmr.msra.gmra.mrb[4].mxu1 %vm677_vm4, %v829_v15 }
 0x4e2   : > { %2697 = vmatpush3.msra.mxu1 %v530_v5  ;;  %2698 = vmatprep.mubr.msk.f32.mxu1 %vm3118_vm2, %v3119_v57 }
 0x4e3   : > { %2701 = vmatprep.subr.mxu1 %v3119_v57 }
 0x4e4   : > { %v906_v17 = vpop.permute.xlu1 %905 }
 0x4e5   : > { %2699 = vmatmul.mubr.msk.f32.vlgmr.msra.gmra.mrb[6].mxu1 %vm677_vm4, %v906_v17 }
 0x4e6   : > { %2702 = vmatpush3.msra.mxu1 %v983_v16  ;;  %2703 = vmatprep.mubr.msk.f32.mxu1 %vm3118_vm2, %v3119_v57 }
 0x4e7   : > { %2807 = vmatprep.subr.bf16.mxu1 %v3116_v50 }
 0x4e8   : > { %v980_v18 = vpop.permute.xlu1 %979 }
 0x4e9   : > { %2704 = vmatmul.mubr.msk.f32.vlgmr.msra.gmra.mrb[8].mxu1 %vm677_vm4, %v980_v18 }
 0x4ea   : > { %2721 = vmatprep.mubr.msk.f32.mxu1 %vm3118_vm2, %v3119_v57  ;;  %2809 = vmatpush3.bf16.msra.mxu1 %v2888_v26  ;;  %v1489_v26 = vld [vmem:[%s3850_s5 + $0x20] sm:$0xff] }
 0x4eb   : > { %2810 = vmatprep.subr.bf16.mxu1 %v3116_v50 }
 0x4ec   : > { %v2961_v28 = vpop.permute.xlu1 %2960 }
 0x4ed   : > { %v2963_v30 = vunpack.i.h.bf16 %v2961_v28  ;;  %v2962_v31 = vunpack.i.l.bf16 %v2961_v28 }
 0x4ef   : > { %v2802_v34 = vpack.c.bf16 %v2963_v30, %v2962_v31  ;;  %v3445_v30 = vld [vmem:[%s3266_s15] sm:$0xff]  ;;  %v3448_v31 = vld [vmem:[%s3266_s15 + $0xc] sm:$0xff] }
 0x4f0   : > { %v2889_v58 = vcombine.low %v3445_v30, %v3448_v31 }
 0x4f1   : > { %2803 = vmatpush3.bf16.msra.mxu0 %v2802_v34 }
 0x4f2   : > { %2804 = vmatprep.subr.bf16.mxu0 %v3116_v50 }
 0x53d   : > { %v747_v22 = vpop.f32.mrb[0].mxu1 }
 0x53e   : > { %v1061_v23 = vadd.f32 %v1060_v20, %v747_v22  ;;  %v2685_v24 = vpop.f32.mrb[1].mxu1 }
 0x540   : > { %v1069_v27 = vrot.slane %v1061_v23, %v3305_v44 }
 0x542   : > { %1070 = vrot.lane.b32.xlu0 %v1069_v27, %s3117_s23 }
 0x546   : > { %2965 = vrot.lane.b32.xlu0 %v2964_v29, %s3125_s17 }
 0x5b0   : > { %v824_v40 = vpop.f32.mrb[2].mxu1 }
 0x5b1   : > { %v1090_v41 = vadd.f32 %v1089_v38, %v824_v40  ;;  %v2690_v42 = vpop.f32.mrb[3].mxu1 }
 0x5b2   : > { %v3455_v42 = vld [vmem:[%s3266_s15 + $0x18] sm:$0xff] }
 0x5b3   : > { %v1098_v46 = vrot.slane %v1090_v41, %v3305_v44 }
 0x5b4   : > { %v1071_v49 = vpop.permute.xlu0 %1070  ;;  %v901_v51 = vpop.f32.mrb[4].mxu1 }
 0x5b5   : > { %v1073_v52 = vmul.f32 %v1071_v49, %v3350_v62  ;;  %1099 = vrot.lane.b32.xlu0 %v1098_v46, %s3117_s23  ;;  %v2695_v53 = vpop.f32.mrb[5].mxu1  ;;  %v1119_v56 = vadd.f32 %v1118_v47, %v901_v51  ;;  %v3458_v46 = vld [vmem:[%s3266_s15 + $0x24] sm:$0xff] }
 0x5b6   : > { %v2890_v53 = vcombine.low %v3455_v42, %v3458_v46 }
 0x5b7   : > { %v1081_v55 = vrot.slane %v1073_v52, %v3305_v44  ;;  %v1127_v4 = vrot.slane %v1119_v56, %v3305_v44 }
 0x5b8   : > { %v975_v59 = vpop.f32.mrb[6].mxu1  ;;  %v2966_v61 = vpop.permute.xlu0 %2965 }
 0x5b9   : > { %v1148_v63 = vadd.f32 %v1147_v54, %v975_v59  ;;  %1082 = vrot.lane.b32.xlu1 %v1081_v55, %s3120_s24  ;;  %v2700_v0 = vpop.f32.mrb[7].mxu1  ;;  %v2968_v2 = vunpack.i.h.bf16 %v2966_v61  ;;  %v2967_v3 = vunpack.i.l.bf16 %v2966_v61 }
 0x5bb   : > { %v1156_v5 = vrot.slane %v1148_v63, %v3305_v44  ;;  %v2805_v33 = vpack.c.bf16 %v2968_v2, %v2967_v3  ;;  %v3471_v63 = vsub.s32 2, %v3290_v32 }
 0x5bc   : > { %v1053_v6 = vpop.f32.mrb[8].mxu1 }
 0x5bd   : > { %v1177_v7 = vadd.f32 %v1176_v1, %v1053_v6  ;;  %1128 = vrot.lane.b32.xlu1 %v1127_v4, %s3117_s23  ;;  %1157 = vrot.lane.b32.xlu0 %v1156_v5, %s3117_s23  ;;  %v2705_v8 = vpop.f32.mrb[9].mxu1  ;;  %v1369_v0 = vrot.slane %v3405_v45, %v3471_v63 }
 0x5be   : > { %2806 = vmatpush3.bf16.msra.mxu0 %v2805_v33 }
 0x5bf   : > { %v1185_v9 = vrot.slane %v1177_v7, %v3305_v44 }
 0x5c1   : > { %1186 = vrot.lane.b32.xlu1 %v1185_v9, %s3117_s23 }
 0x627   : > { %v1100_v37 = vpop.permute.xlu0 %1099 }
 0x628   : > { %v1102_v10 = vmul.f32 %v1100_v37, %v3350_v62 }
 0x62a   : > { %v1110_v11 = vrot.slane %v1102_v10, %v3305_v44 }
 0x62b   : > { %v1083_v12 = vpop.permute.xlu1 %1082 }
 0x62c   : > { %v1085_v13 = vadd.f32 %v1083_v12, %v3313_v48  ;;  %1111 = vrot.lane.b32.xlu0 %v1110_v11, %s3120_s24 }
 0x62e   : > { %2715 = vmatmul.mubr.msk.f32.vlgmr.msra.gmra.mrb[2].mxu0 %vm598_vm3, %v1085_v13 }
 0x62f   : > { %v1158_v14 = vpop.permute.xlu0 %1157  ;;  %v1129_v15 = vpop.permute.xlu1 %1128  ;;  %1562 = vmatprep.mubr.f32.mxu0 %v3119_v57 }
 0x630   : > { %v1160_v16 = vmul.f32 %v1158_v14, %v3350_v62  ;;  %v1131_v17 = vmul.f32 %v1129_v15, %v3350_v62  ;;  %v1486_v14 = vld [vmem:[%s3850_s5 + $0x8] sm:$0xff]  ;;  %v1488_v15 = vld [vmem:[%s3850_s5 + $0x18] sm:$0xff] }
 0x632   : > { %v1168_v18 = vrot.slane %v1160_v16, %v3305_v44  ;;  %v1139_v20 = vrot.slane %v1131_v17, %v3305_v44  ;;  %v1485_v16 = vld [vmem:[%s3850_s5] sm:$0xff]  ;;  %v2816_v17 = vpack.c.bf16 %v1488_v15, %v1486_v14  ;;  %v1662_v14 = vld [vmem:[%s3851_s6 + $0x38] sm:$0xff] }
 0x633   : > { %v1187_v22 = vpop.permute.xlu1 %1186  ;;  %v1679_v15 = vld [vmem:[%s3851_s6 + $0xc0] sm:$0xff] }
 0x634   : > { %v1189_v23 = vmul.f32 %v1187_v22, %v3350_v62  ;;  %1169 = vrot.lane.b32.xlu0 %v1168_v18, %s3120_s24  ;;  %1140 = vrot.lane.b32.xlu1 %v1139_v20, %s3120_s24  ;;  %v1487_v18 = vld [vmem:[%s3850_s5 + $0x10] sm:$0xff]  ;;  %v1490_v20 = vld [vmem:[%s3850_s5 + $0x28] sm:$0xff] }
 0x635   : > { %v1492_v22 = vld [vmem:[%s3850_s5 + $0x38] sm:$0xff]  ;;  %2817 = vmatprep.subr.bf16.mxu0 %v2816_v17 }
 0x636   : > { %v1197_v24 = vrot.slane %v1189_v23, %v3305_v44  ;;  %v1589_v23 = vcombine.high %v3346_v60, %v3346_v60  ;;  %v2820_v25 = vpack.c.bf16 %v1492_v22, %v1490_v20 }
 0x638   : > { %1198 = vrot.lane.b32.xlu1 %v1197_v24, %s3120_s24  ;;  %v2818_v24 = vpack.c.bf16 %v1487_v18, %v1485_v16  ;;  %v1680_v16 = vld [vmem:[%s3851_s6 + $0xc8] sm:$0xff] }
 0x639   : > { %v2840_v20 = vpack.c.bf16 %v1680_v16, %v1679_v15 }
 0x63a   : > { %2819 = vmatpush1.bf16.msra.mxu0 %v2818_v24  ;;  %v1664_v24 = vld [vmem:[%s3851_s6 + $0x48] sm:$0xff] }
 0x63b   : > { %2821 = vmatprep.subr.bf16.mxu0 %v2820_v25 }
 0x69e   : > { %v1112_v29 = vpop.permute.xlu0 %1111 }
 0x69f   : > { %v1114_v40 = vadd.f32 %v1112_v29, %v3313_v48  ;;  %v3512_v29 = vrot.slane %v1589_v23, %v3305_v44  ;;  %v1663_v23 = vld [vmem:[%s3851_s6 + $0x40] sm:$0xff] }
 0x6a0   : > { %v2842_v25 = vpack.c.bf16 %v1664_v24, %v1663_v23 }
 0x6a1   : > { %v1377_v52 = vrot.slane %v1114_v40, 6  ;;  %v1671_v40 = vld [vmem:[%s3851_s6 + $0x80] sm:$0xff] }
 0x6a6   : > { %v1141_v62 = vpop.permute.xlu1 %1140  ;;  %v1170_v34 = vpop.permute.xlu0 %1169 }
 0x6a7   : > { %v1143_v41 = vadd.f32 %v1141_v62, %v3313_v48  ;;  %v1172_v49 = vadd.f32 %v1170_v34, %v3313_v48 }
 0x6a9   : > { %v1380_v54 = vrot.slane %v1143_v41, 4  ;;  %v1386_v55 = vsel %vm1385_vm6, %v1172_v49, %v1377_v52  ;;  %v1655_v41 = vld [vmem:[%s3851_s6] sm:$0xff]  ;;  %v1656_v49 = vld [vmem:[%s3851_s6 + $0x8] sm:$0xff]  ;;  %v1674_v52 = vld [vmem:[%s3851_s6 + $0x98] sm:$0xff] }
 0x6aa   : > { %v1199_v38 = vpop.permute.xlu1 %1198 }
 0x6ab   : > { %v1201_v51 = vadd.f32 %v1199_v38, %v3313_v48  ;;  %v1388_v59 = vsel %vm1387_vm7, %v1386_v55, %v1380_v54  ;;  %v1657_v55 = vld [vmem:[%s3851_s6 + $0x10] sm:$0xff] }
 0x6ad   : > { %v1383_v56 = vrot.slane %v1201_v51, 2  ;;  %v1673_v51 = vld [vmem:[%s3851_s6 + $0x90] sm:$0xff] }
 0x6ae   : > { %v2828_v54 = vpack.c.bf16 %v1674_v52, %v1673_v51  ;;  %v1685_v52 = vld [vmem:[%s3851_s6 + $0xf0] sm:$0xff] }
 0x6af   : > { %v1390_v61 = vsel %vm1389_vm8, %v1388_v59, %v1383_v56  ;;  %v1658_v56 = vld [vmem:[%s3851_s6 + $0x18] sm:$0xff]  ;;  %v1675_v59 = vld [vmem:[%s3851_s6 + $0xa0] sm:$0xff] }
 0x701   : > { %v1287_v27 = vpop.f32.mrb[2].mxu0 }
 0x702   : > { %3001 = vtanh.f32 %v1287_v27  ;;  %v2716_v28 = vpop.f32.mrb[3].mxu0  ;;  %v1491_v27 = vld [vmem:[%s3850_s5 + $0x30] sm:$0xff] }
 0x703   : > { %v2822_v28 = vpack.c.bf16 %v1491_v27, %v1489_v26  ;;  %v1681_v26 = vld [vmem:[%s3851_s6 + $0xd0] sm:$0xff]  ;;  %v1682_v27 = vld [vmem:[%s3851_s6 + $0xd8] sm:$0xff] }
 0x705   : > { %2823 = vmatpush1.bf16.msra.mxu0 %v2822_v28  ;;  %v2844_v28 = vpack.c.bf16 %v1682_v27, %v1681_v26 }
 0x706   : > { %2856 = vmatprep.subr.bf16.mxu0 %v3116_v50 }
 0x70c   : > { %v3002_v47 = vpop.eup %3001 }
 0x70d   : > { %2722 = vmatmul.mubr.msk.f32.vlgmr.msra.gmra.mrb[10].mxu1 %vm1292_vm5, %v3002_v47 }
 0x70e   : > { %2812 = vmatpush3.bf16.msra.mxu1 %v2889_v58  ;;  %2732 = vmatprep.mubr.msk.f32.mxu1 %vm3118_vm2, %v3119_v57  ;;  %v1672_v58 = vld [vmem:[%s3851_s6 + $0x88] sm:$0xff] }
 0x70f   : > { %2813 = vmatprep.subr.bf16.mxu1 %v3116_v50  ;;  %v2824_v47 = vpack.c.bf16 %v1672_v58, %v1671_v40  ;;  %v1683_v40 = vld [vmem:[%s3851_s6 + $0xe0] sm:$0xff]  ;;  %v1684_v58 = vld [vmem:[%s3851_s6 + $0xe8] sm:$0xff] }
 0x712   : > { %2815 = vmatpush3.bf16.msra.mxu1 %v2890_v53  ;;  %v2826_v53 = vpack.c.bf16 %v1656_v49, %v1655_v41  ;;  %v2848_v41 = vpack.c.bf16 %v1684_v58, %v1683_v40  ;;  %v1668_v49 = vld [vmem:[%s3851_s6 + $0x68] sm:$0xff]  ;;  %v1771_v40 = vld [vmem:[%s3852_s7 + $0x18] sm:$0xff] }
 0x713   : > { %2825 = vmatprep.subr.bf16.mxu1 %v2824_v47  ;;  %v1667_v47 = vld [vmem:[%s3851_s6 + $0x60] sm:$0xff] }
 0x714   : > { %v2850_v51 = vpack.c.bf16 %v1668_v49, %v1667_v47 }
 0x715   : > { %2733 = vmatmul.mubr.msk.f32.vlgmr.msra.gmra.mrb[12].mxu1 %vm598_vm3, %v1390_v61 }
 0x716   : > { %2827 = vmatpush3.bf16.msra.mxu1 %v2826_v53  ;;  %v1686_v53 = vld [vmem:[%s3851_s6 + $0xf8] sm:$0xff] }
 0x717   : > { %2829 = vmatprep.subr.bf16.mxu1 %v2828_v54  ;;  %v2852_v54 = vpack.c.bf16 %v1686_v53, %v1685_v52  ;;  %v1846_v53 = vld [vmem:[%s3853_s8] sm:$0xf] }
 0x7e0   : > { %v1362_v1 = vpop.f32.mrb[10].mxu1 }
 0x7e1   : > { %v1370_v2 = vadd.f32 %v1369_v0, %v1362_v1  ;;  %v2723_v3 = vpop.f32.mrb[11].mxu1  ;;  %v1676_v0 = vld [vmem:[%s3851_s6 + $0xa8] sm:$0xff] }
 0x7e2   : > { %v2832_v3 = vpack.c.bf16 %v1676_v0, %v1675_v59 }
 0x7e3   : > { %v1371_v4 = vmul.f32 1.442695, %v1370_v2  ;;  %v2830_v2 = vpack.c.bf16 %v1658_v56, %v1657_v55  ;;  %v1669_v55 = vld [vmem:[%s3851_s6 + $0x70] sm:$0xff]  ;;  %v1670_v56 = vld [vmem:[%s3851_s6 + $0x78] sm:$0xff] }
 0x7e4   : > { %v2854_v59 = vpack.c.bf16 %v1670_v56, %v1669_v55 }
 0x7e5   : > { %3003 = vpow2.f32 %v1371_v4  ;;  %v1659_v4 = vld [vmem:[%s3851_s6 + $0x20] sm:$0xff]  ;;  %2831 = vmatpush3.bf16.msra.mxu1 %v2830_v2 }
 0x7e6   : > { %2833 = vmatprep.subr.bf16.mxu1 %v2832_v3 }
 0x7e8   : > { %v3475_v5 = vpop.f32.mrb[12].mxu1 }
 0x7e9   : > { %v2734_v33 = vpop.f32.mrb[13].mxu1  ;;  %v1474_v6 = vrot.slane %v3475_v5, 6  ;;  %v2553_v7 = vmul.f32 -1.442695, %v3475_v5  ;;  %v1472_v1 = vrot.slane %v3475_v5, 2 }
 0x7ea   : > { %v1660_v33 = vld [vmem:[%s3851_s6 + $0x28] sm:$0xff] }
 0x7eb   : > { %1475 = vrot.lane.b32.xlu0 %v1474_v6, %s3117_s23  ;;  %3005 = vpow2.f32 %v2553_v7 }
 0x7ef   : > { %v3004_v8 = vpop.eup %3003 }
 0x7f0   : > { %v1373_v9 = vsub.f32 0.0, %v3004_v8  ;;  %v1677_v8 = vld [vmem:[%s3851_s6 + $0xb0] sm:$0xff] }
 0x7f2   : > { %v1374_v37 = vmul.f32 1.442695, %v1373_v9  ;;  %v1678_v9 = vld [vmem:[%s3851_s6 + $0xb8] sm:$0xff] }
 0x7f4   : > { %3007 = vpow2.f32 %v1374_v37 }
 0x7f5   : > { %v3006_v10 = vpop.eup %3005 }
 0x7f6   : > { %v1467_v11 = vadd.f32 1.0, %v3006_v10  ;;  %v3567_v10 = vrot.slane %v3346_v60, %v3305_v44 }
 0x7f8   : > { %3009 = vrcp.f32 %v1467_v11  ;;  %v2834_v11 = vpack.c.bf16 %v1660_v33, %v1659_v4  ;;  %v1636_v17 = vcombine.high %v3567_v10, %v3567_v10 }
 0x7fa   : > { %2835 = vmatpush3.bf16.msra.mxu1 %v2834_v11 }
 0x7fe   : > { %v3008_v12 = vpop.eup %3007 }
 0x7ff   : > { %v1479_v13 = vrot.slane %v3008_v12, 4  ;;  %v2836_v12 = vpack.c.bf16 %v1678_v9, %v1677_v8  ;;  %v1629_v8 = vrot.slane %v3405_v45, %v3402_v39 }
 0x801   : > { %1480 = vrot.lane.b32.xlu1 %v1479_v13, %s3117_s23  ;;  %v1661_v13 = vld [vmem:[%s3851_s6 + $0x30] sm:$0xff]  ;;  %2837 = vmatprep.subr.bf16.mxu1 %v2836_v12 }
 0x802   : > { %v3010_v62 = vpop.eup %3009  ;;  %v2838_v18 = vpack.c.bf16 %v1662_v14, %v1661_v13 }
 0x803   : > { %v1470_v34 = vmul.f32 %v3010_v62, %v3475_v5  ;;  %v1665_v62 = vld [vmem:[%s3851_s6 + $0x50] sm:$0xff] }
 0x804   : > { %2839 = vmatpush3.bf16.msra.mxu1 %v2838_v18 }
 0x805   : > { %1569 = vrot.lane.b32.xlu1 %v3475_v5, %s3121_s27  ;;  %v1947_v38 = vrot.slane %v1470_v34, 6  ;;  %2841 = vmatprep.subr.bf16.mxu1 %v2840_v20  ;;  %v1666_v34 = vld [vmem:[%s3851_s6 + $0x58] sm:$0xff] }
 0x808   : > { %2843 = vmatpush3.bf16.msra.mxu1 %v2842_v25 }
 0x809   : > { %1575 = vrot.lane.b32.xlu1 %v3475_v5, %s3117_s23  ;;  %2845 = vmatprep.subr.bf16.mxu1 %v2844_v28  ;;  %v1768_v28 = vld [vmem:[%s3852_s7] sm:$0xff] }
 0x80d   : > { %1639 = vrot.lane.b32.xlu1 %v3512_v29, %s3121_s27 }
 0x811   : > { %1948 = vrot.lane.b32.xlu1 %v1947_v38, %s3117_s23  ;;  %v2846_v38 = vpack.c.bf16 %v1666_v34, %v1665_v62  ;;  %v1769_v62 = vld [vmem:[%s3852_s7 + $0x8] sm:$0xff] }
 0x812   : > { %v2857_v34 = vpack.c.bf16 %v1769_v62, %v1768_v28 }
 0x813   : > { %2847 = vmatpush3.bf16.msra.mxu1 %v2846_v38  ;;  %v1770_v38 = vld [vmem:[%s3852_s7 + $0x10] sm:$0xff] }
 0x814   : > { %2849 = vmatprep.subr.bf16.mxu1 %v2848_v41  ;;  %v2860_v58 = vpack.c.bf16 %v1771_v40, %v1770_v38 }
 0x817   : > { %2851 = vmatpush3.bf16.msra.mxu1 %v2850_v51 }
 0x818   : > { %2853 = vmatprep.subr.bf16.mxu1 %v2852_v54 }
 0x81b   : > { %2855 = vmatpush3.bf16.msra.mxu1 %v2854_v59 }
 0x85d   : > { %v1476_v61 = vpop.permute.xlu0 %1475 }
 0x85e   : > { %v1483_v6 = vsel %vm1385_vm6, %v1472_v1, %v1476_v61 }
 0x873   : > { %v1481_v7 = vpop.permute.xlu1 %1480 }
 0x874   : > { %v1484_v37 = vsel %vm1387_vm7, %v1483_v6, %v1481_v7  ;;  %v506_v6 = vld [vmem:[%s3271_s22 + $0x18] sm:$0xff] }
 0x875   : > { %1494 = vrot.lane.b32.xlu0 %v1484_v37, %s3120_s24  ;;  %v1633_v37 = vrot.slane %v506_v6, %v3402_v39 }
 0x877   : > { %v1570_v0 = vpop.permute.xlu1 %1569 }
 0x879   : > { %1572 = vrot.lane.b32.xlu0 %v3475_v5, %s3120_s24 }
 0x87b   : > { %v1576_v3 = vpop.permute.xlu1 %1575 }
 0x87d   : > { %1637 = vrot.lane.b32.xlu0 %v1636_v17, %s3121_s27 }
 0x87f   : > { %v1640_v15 = vpop.permute.xlu1 %1639 }
 0x881   : > { %1608 = vrot.lane.b32.xlu0 %v3567_v10, %s3121_s27 }
 0x8e7   : > { %v1495_v22 = vpop.permute.xlu0 %1494 }
 0x8e8   : > { %2554 = vmatmul.mubr.msk.f32.vlgmr.msra.gmra.mrb[4].mxu0 %vm598_vm3, %v1495_v22 }
 0x8e9   : > { %2743 = vmatprep.mubr.msk.f32.mxu0 %vm3118_vm2, %v3119_v57  ;;  %2858 = vmatpush3.bf16.msra.mxu0 %v2857_v34 }
 0x8ea   : > { %2859 = vmatprep.subr.bf16.mxu0 %v3116_v50 }
 0x8eb   : > { %v1573_v61 = vpop.permute.xlu0 %1572 }
 0x8ec   : > { %v1578_v1 = vsel %vm598_vm3, %v1570_v0, %v1573_v61  ;;  %v2891_v61 = vcombine.high %v3445_v30, %v3448_v31  ;;  %v2892_v0 = vcombine.high %v3455_v42, %v3458_v46 }
 0x8ed   : > { %v1580_v2 = vsel %vm1579_vm9, %v1578_v1, %v3475_v5  ;;  %2861 = vmatpush3.bf16.msra.mxu0 %v2860_v58  ;;  %v522_v58 = vunpack.c.h.bf16 %v3455_v42 }
 0x8ee   : > { %v1582_v33 = vsel %vm1581_vm10, %v1580_v2, %v1576_v3  ;;  %2746 = vmatprep.subr.mxu0 %v3119_v57 }
 0x8ef   : > { %v1638_v4 = vpop.permute.xlu0 %1637  ;;  %v1584_v7 = vrot.slane %v1582_v33, 4 }
 0x8f0   : > { %v1642_v39 = vsel %vm1579_vm9, %v1638_v4, %v1640_v15 }
 0x8f3   : > { %v3645_v12 = vpop.permute.xlu0 %1608 }
 0x8f4   : > { %v1641_v16 = vsel %vm1579_vm9, %v3645_v12, %v1638_v4 }
 0x9bb   : > { %v3639_v9 = vpop.f32.mrb[4].mxu0 }
 0x9bc   : > { %v3643_v11 = vmul.f32 %v1584_v7, %v3639_v9  ;;  %v3647_v13 = vpop.f32.mrb[5].mxu0 }
 0x9bd   : > { %v3650_v5 = vmul.f32 %v1584_v7, %v3647_v13  ;;  %v3691_v7 = vsub.s32 3, %v3290_v32 }
 0x9be   : > { %v1634_v14 = vmul.f32 %v1629_v8, %v3643_v11 }
 0x9bf   : > { %v1635_v17 = vmul.f32 %v1633_v37, %v3650_v5  ;;  %v1939_v15 = vrot.slane %v3405_v45, %v3691_v7 }
 0x9c0   : > { %v1645_v18 = vadd.f32 %v1641_v16, %v1634_v14  ;;  %v1944_v16 = vrot.slane %v3405_v45, %v572_v43  ;;  %v516_v43 = vunpack.c.h.bf16 %v3445_v30  ;;  %v1604_v30 = vcombine.low %v3567_v10, %v3567_v10 }
 0x9c1   : > { %v1646_v20 = vadd.f32 %v1642_v39, %v1635_v17 }
 0x9c2   : > { %v1649_v22 = vrot.slane %v1645_v18, 6 }
 0x9c3   : > { %v1650_v23 = vrot.slane %v1646_v20, 6  ;;  %v1949_v20 = vpop.permute.xlu1 %1948 }
 0x9c4   : > { %v1653_v24 = vmul.f32 %v1649_v22, %v3639_v9 }
 0x9c5   : > { %v1654_v25 = vmul.f32 %v1650_v23, %v3647_v13 }
 0x9c6   : > { %v1689_v27 = vrot.slane %v1653_v24, 2 }
 0x9c7   : > { %v1690_v26 = vrot.slane %v1654_v25, 2 }
 0x9c9   : > { %1757 = vmatprep.mubr.f32.mxu1 %v1690_v26 }
 0x9ca   : > { %1758 = vmatmul.mubr.f32.vlgmr.msra.gmra.mrb[14].mxu1 %v1689_v27  ;;  %v519_v27 = vunpack.c.h.bf16 %v3448_v31 }
 0x9cc   : > { %v2969_v28 = vpack.i.bf16 %v519_v27, %v516_v43  ;;  %v1605_v27 = vcombine.low %v3512_v29, %v3512_v29 }
 0xa9d   : > { %v2640_v41 = vpop.f32.mrb[14].mxu1 }
 0xa9e   : > { %v2641_v47 = vpop.f32.mrb[15].mxu1 }
 0xa9f   : > { %v2642_v49 = vadd.f32 %v2641_v47, %v2640_v41  ;;  %v525_v41 = vunpack.c.h.bf16 %v3458_v46 }
 0xaa1   : > { %v1763_v51 = vmul.f32 %v2642_v49, %v2642_v49  ;;  %v2974_v47 = vpack.i.bf16 %v525_v41, %v522_v58 }
 0xaa3   : > { %v1765_v52 = vrot.slane %v1763_v51, 6 }
 0xaa5   : > { %v1767_v54 = vsel %vm1385_vm6, %v2642_v49, %v1765_v52 }
 0xaa6   : > { %2744 = vmatmul.mubr.msk.f32.vlgmr.msra.gmra.mrb[6].mxu0 %vm598_vm3, %v1767_v54 }
 0xaa7   : > { %2747 = vmatpush3.msk.msra.mxu0 %vm1387_vm7, %v1846_v53  ;;  %2748 = vmatprep.mubr.msk.f32.mxu0 %vm3118_vm2, %v3119_v57 }
 0xaa8   : > { %2862 = vmatprep.subr.bf16.mxu0 %v3116_v50 }
 0xb79   : > { %v1841_v55 = vpop.f32.mrb[6].mxu0 }
 0xb7a   : > { %v1845_v56 = vmul.f32 0.125, %v1841_v55  ;;  %v2745_v59 = vpop.f32.mrb[7].mxu0 }
 0xb7c   : > { %2749 = vmatmul.mubr.msk.f32.vlgmr.msra.gmra.mrb[8].mxu0 %vm1847_vm11, %v1845_v56 }
 0xb7d   : > { %2759 = vmatprep.mubr.msk.f32.mxu0 %vm3118_vm2, %v3119_v57  ;;  %2864 = vmatpush3.bf16.msra.mxu0 %v2891_v61 }
 0xb7e   : > { %2865 = vmatprep.subr.bf16.mxu0 %v3116_v50 }
 0xb81   : > { %2867 = vmatpush3.bf16.msra.mxu0 %v2892_v0  ;;  %v2047_v0 = vrot.slane %v3294_v36, %v3691_v7 }
 0xb82   : > { %2868 = vmatprep.subr.bf16.mxu0 %v3116_v50 }
 0xc4f   : > { %v1920_v1 = vpop.f32.mrb[8].mxu0 }
 0xc50   : > { %v1924_v2 = vmul.f32 %v1920_v1, %v1920_v1  ;;  %v2750_v3 = vpop.f32.mrb[9].mxu0  ;;  %v1929_v37 = vsub.f32 %v2642_v49, %v1920_v1 }
 0xc51   : > { %v2059_v3 = vrot.slane %v3405_v45, %v1088_v35 }
 0xc52   : > { %v1926_v4 = vrot.slane %v1924_v2, 6  ;;  %v2053_v2 = vrot.slane %v3405_v45, %v1059_v19 }
 0xc54   : > { %v1928_v33 = vsub.f32 %v1920_v1, %v1926_v4 }
 0xc56   : > { %v1930_v6 = vadd.f32 1e-05, %v1928_v33 }
 0xc58   : > { %3011 = vrsqrt.f32 %v1930_v6 }
 0xc62   : > { %v3012_v8 = vpop.eup %3011 }
 0xc63   : > { %v1933_v14 = vrot.slane %v3012_v8, 2 }
 0xc65   : > { %v1935_v17 = vmul.f32 %v1933_v14, %v1929_v37 }
 0xc67   : > { %v1940_v39 = vmul.f32 %v1939_v15, %v1935_v17 }
 0xc69   : > { %v1945_v18 = vadd.f32 %v1944_v16, %v1940_v39 }
 0xc6b   : > { %v1951_v22 = vmul.f32 %v1949_v20, %v1945_v18 }
 0xc6d   : > { %2760 = vmatmul.mubr.msk.f32.vlgmr.msra.gmra.mrb[10].mxu0 %vm598_vm3, %v1951_v22 }
 0xc6e   : > { %2770 = vmatprep.mubr.msk.f32.mxu0 %vm3118_vm2, %v3119_v57 }
 0xd40   : > { %v2021_v23 = vpop.f32.mrb[10].mxu0 }
 0xd41   : > { %v3702_v24 = vadd.f32 %v2021_v23, %v3284_v21  ;;  %v2761_v25 = vpop.f32.mrb[11].mxu0 }
 0xd43   : > { %v2026_v26 = vsel %vm533_vm1, %v3702_v24, 0.0 }
 0xd44   : > { %2027 = vadd.xlane.f32.xlu0 %v2026_v26 }
 0xd5a   : > { %2970 = vrot.lane.b32.xlu0 %v2969_v28, %s3120_s24 }
 0xd5e   : > { %2980 = vrot.lane.b32.xlu0 %v2969_v28, %s3117_s23 }
 0xdd1   : > { %v2028_v62 = vpop.xlane.xlu0 %2027 }
 0xdd2   : > { %v2029_v34 = vmul.f32 0.03125, %v2028_v62 }
 0xdd4   : > { %v2030_v38 = vsub.f32 %v3702_v24, %v2029_v34 }
 0xdd5   : > { %v2971_v31 = vpop.permute.xlu0 %2970 }
 0xdd6   : > { %v2031_v40 = vmul.f32 %v2030_v38, %v2030_v38  ;;  %v2973_v49 = vunpack.i.h.bf16 %v2971_v31  ;;  %v2972_v51 = vunpack.i.l.bf16 %v2971_v31 }
 0xdd8   : > { %v2032_v21 = vsel %vm533_vm1, %v2031_v40, 0.0  ;;  %v2869_v52 = vpack.c.bf16 %v2973_v49, %v2972_v51 }
 0xdd9   : > { %2033 = vadd.xlane.f32.xlu1 %v2032_v21  ;;  %v2981_v19 = vpop.permute.xlu0 %2980 }
 0xdda   : > { %2870 = vmatpush3.bf16.msra.mxu0 %v2869_v52  ;;  %v2983_v35 = vunpack.i.h.bf16 %v2981_v19  ;;  %v2982_v45 = vunpack.i.l.bf16 %v2981_v19 }
 0xddb   : > { %2871 = vmatprep.subr.bf16.mxu0 %v3116_v50 }
 0xddc   : > { %v2875_v39 = vpack.c.bf16 %v2983_v35, %v2982_v45 }
 0xdea   : > { %2975 = vrot.lane.b32.xlu1 %v2974_v47, %s3120_s24 }
 0xdee   : > { %2985 = vrot.lane.b32.xlu1 %v2974_v47, %s3117_s23 }
 0xdf2   : > { %1606 = vrot.lane.b32.xlu1 %v1604_v30, %s3121_s27 }
 0xdf6   : > { %2254 = vrot.lane.b32.xlu1 %v3313_v48, %s3117_s23  ;;  %v2042_v48 = vrot.slane %v3294_v36, %v3471_v63 }
 0xe66   : > { %v2034_v42 = vpop.xlane.xlu1 %2033 }
 0xe67   : > { %v2035_v46 = vmul.f32 0.03125, %v2034_v42 }
 0xe69   : > { %v2036_v53 = vadd.f32 1e-05, %v2035_v46 }
 0xe6a   : > { %v2976_v54 = vpop.permute.xlu1 %2975 }
 0xe6b   : > { %3013 = vrsqrt.f32 %v2036_v53  ;;  %v2978_v10 = vunpack.i.h.bf16 %v2976_v54  ;;  %v2977_v55 = vunpack.i.l.bf16 %v2976_v54 }
 0xe6d   : > { %v2872_v56 = vpack.c.bf16 %v2978_v10, %v2977_v55 }
 0xe6e   : > { %v2986_v36 = vpop.permute.xlu1 %2985 }
 0xe6f   : > { %2873 = vmatpush3.bf16.msra.mxu0 %v2872_v56  ;;  %v2988_v32 = vunpack.i.h.bf16 %v2986_v36  ;;  %v2987_v17 = vunpack.i.l.bf16 %v2986_v36 }
 0xe70   : > { %2874 = vmatprep.subr.bf16.mxu0 %v3116_v50 }
 0xe72   : > { %v1607_v18 = vpop.permute.xlu1 %1606 }
 0xe73   : > { %v1612_v25 = vsel %vm1579_vm9, %v1607_v18, %v3645_v12 }
 0xe74   : > { %v1616_v26 = vmul.f32 %v1612_v25, %v3639_v9 }
 0xe75   : > { %v3014_v59 = vpop.eup %3013 }
 0xe76   : > { %v2038_v61 = vmul.f32 %v3014_v59, %v2030_v38  ;;  %v1620_v28 = vrot.slane %v1616_v26, 4  ;;  %v2255_v21 = vpop.permute.xlu1 %2254 }
 0xe78   : > { %v2043_v1 = vmul.f32 %v2042_v48, %v2038_v61 }
 0xe7a   : > { %v2048_v4 = vadd.f32 %v2047_v0, %v2043_v1  ;;  %v2572_v1 = vld [vmem:[%s3855_s10] sm:$0xff] (!%p2562_p12)  }
 0xe7c   : > { %v2049_v33 = vsub.f32 %v3346_v60, %v2048_v4  ;;  %v2878_v60 = vpack.c.bf16 %v2988_v32, %v2987_v17 }
 0xe7e   : > { %v2054_v6 = vmul.f32 %v2053_v2, %v2049_v33  ;;  %v2060_v8 = vmul.f32 %v2059_v3, %v2049_v33  ;;  %v3128_v2 = vmov (!%p2562_p12), 0.0   ;;  %v2579_v3 = vld [vmem:[%s3855_s10 + $0x8] sm:$0xff] (!%p2562_p12)  }
 0xe80   : > { %v2055_v37 = vadd.f32 %v2054_v6, %v2048_v4  ;;  %v2061_v14 = vadd.f32 %v2060_v8, %v2048_v4  ;;  %v2293_v8 = vld [vmem:[%s3854_s9] sm:$0xf] (!%p2562_p12) }
 0xe82   : > { %v2063_v15 = vrot.slane %v2055_v37, 6  ;;  %v2310_v37 = vrot.slane (!%p2562_p12), %v2293_v8, %v3471_v63 }
 0xe84   : > { %v2065_v16 = vsel %vm1385_vm6, %v2061_v14, %v2063_v15 }
 0xe85   : > { %2771 = vmatmul.mubr.msk.f32.vlgmr.msra.gmra.mrb[12].mxu0 %vm598_vm3, %v2065_v16  ;;  %v2315_v16 = vrot.slane (!%p2562_p12), %v2293_v8, %v3691_v7 }
 0xe86   : > { %2781 = vmatprep.mubr.msk.f32.mxu0 %vm3118_vm2, %v3119_v57  ;;  %2876 = vmatpush3.bf16.msra.mxu0 %v2875_v39 }
 0xe87   : > { %2877 = vmatprep.subr.bf16.mxu0 %v3116_v50  ;;  %v1624_v50 = vadd.f32 %v1620_v28, %v3643_v11  ;;  %v2266_v11 = vsel %vm598_vm3, %v2048_v4, %v2255_v21 }
 0xe8a   : > { %2879 = vmatpush3.bf16.msra.mxu0 %v2878_v60 }
 0xf58   : > { %v2151_v20 = vpop.f32.mrb[12].mxu0 }
 0xf59   : > { %v2161_v22 = vmax.f32 %v2151_v20, 0.0  ;;  %v2772_v23 = vpop.f32.mrb[13].mxu0 }
 0xf5b   : > { %v2162_v57 = vmul.f32 %v2161_v22, %v2161_v22 }
 0xf5d   : > { %v2164_v43 = vrot.slane %v2162_v57, 2 }
 0xf5f   : > { %2165 = vrot.lane.b32.xlu0 %v2164_v43, %s3120_s24 }
 0xf63   : > { %1610 = vrot.lane.b32.xlu0 %v1605_v27, %s3121_s27 }
 0xf67   : > { %2259 = vrot.lane.b32.xlu0 %v1624_v50, %s3121_s27 }
 0xfd1   : > { %v2166_v62 = vpop.permute.xlu0 %2165 }
 0xfd2   : > { %2782 = vmatmul.mubr.msk.f32.vlgmr.msra.gmra.mrb[14].mxu0 %vm598_vm3, %v2166_v62 }
 0xfd3   : > { %2792 = vmatprep.mubr.msk.f32.mxu0 (!%p2562_p12), %vm3127_vm12, %v3128_v2 }
 0xfd5   : > { %v1611_v34 = vpop.permute.xlu0 %1610 }
 0xfd6   : > { %v1613_v9 = vsel %vm1579_vm9, %v3645_v12, %v1611_v34 }
 0xfd7   : > { %v1617_v38 = vmul.f32 %v1613_v9, %v3647_v13 }
 0xfd9   : > { %v1621_v40 = vrot.slane %v1617_v38, 4  ;;  %v2260_v58 = vpop.permute.xlu0 %2259 }
 0xfda   : > { %v2267_v47 = vsel %vm1579_vm9, %v2266_v11, %v2260_v58 }
 0xfdb   : > { %v1625_v29 = vadd.f32 %v1621_v40, %v3650_v5  ;;  %v2560_v5 = vmul.f32 -1.442695, %v2151_v20 }
 0xfdd   : > { %2261 = vrot.lane.b32.xlu1 %v1625_v29, %s3121_s27  ;;  %3015 = vpow2.f32 %v2560_v5 }
 0xfe7   : > { %v3016_v52 = vpop.eup %3015 }
 0xfe8   : > { %v2158_v42 = vadd.f32 1.0, %v3016_v52 }
 0xfea   : > { %3017 = vrcp.f32 %v2158_v42 }
 0xff4   : > { %v3018_v46 = vpop.eup %3017 }
0x104f   : > { %v2262_v41 = vpop.permute.xlu1 %2261 }
0x1050   : > { %v2263_v30 = vsel %vm1579_vm9, %v2260_v58, %v2262_v41  ;;  %v2268_v31 = vsel %vm1579_vm9, %v2262_v41, 0.0 }
0x1051   : > { %v2271_v12 = vcombine.low %v2267_v47, %v2263_v30  ;;  %v2285_v13 = vrot.slane %v2268_v31, %v3305_v44 }
0x1053   : > { %v2278_v49 = vrot.slane %v2271_v12, %v3305_v44 }
0x1055   : > { %v2286_v51 = vcombine.low %v2278_v49, %v2285_v13 }
0x1057   : > { %2288 = vst [vmem:[%s450_s11] sm:$0x3f] %v2286_v51 }
0x10a4   : > { %2292 = sbr.rel (%p2562_p12) target bundleno = 4792 (0x12b8), region = 72 }
0x10a5   : > { %v2247_v53 = vpop.f32.mrb[14].mxu0 }
0x10a6   : > { %v2251_v54 = vmul.f32 %v3018_v46, %v2247_v53  ;;  %v2783_v10 = vpop.f32.mrb[15].mxu0 }
0x10a8   : > { %v2252_v55 = vadd.f32 %v2251_v54, %v3702_v24  ;;  %v3126_v24 = vmov (!%p2562_p12), 0.0|0.0  }
0x10a9   : > { %2880 = vmatprep.subr.bf16.mxu0 (!%p2562_p12), %v3126_v24 }
0x10aa   : > { %2253 = vst.msk [vmem:[#allocation2] sm:$0x3] %vm533_vm1, %v2252_v55  ;;  %v2294_v44 = vsel (!%p2562_p12), %vm533_vm1, %v2252_v55, 0.0  ;;  %2882 = vmatpush3.bf16.msra.mxu0 (!%p2562_p12), %v2572_v1 }
0x10ab   : > { %2295 = vadd.xlane.f32.xlu0 %v2294_v44  ;;  %2883 = vmatprep.subr.bf16.mxu0 %v3126_v24 }
0x10ae   : > { %2885 = vmatpush3.bf16.msra.mxu0 %v2579_v3 }
0x1138   : > { %v2296_v56 = vpop.xlane.xlu0 %2295 }
0x1139   : > { %v2297_v48 = vmul.f32 0.03125, %v2296_v56 }
0x113b   : > { %v2298_v59 = vsub.f32 %v2252_v55, %v2297_v48 }
0x113d   : > { %v2299_v61 = vmul.f32 %v2298_v59, %v2298_v59 }
0x113f   : > { %v2300_v0 = vsel %vm533_vm1, %v2299_v61, 0.0 }
0x1140   : > { %2301 = vadd.xlane.f32.xlu0 %v2300_v0 }
0x11cd   : > { %v2302_v4 = vpop.xlane.xlu0 %2301 }
0x11ce   : > { %v2303_v33 = vmul.f32 0.03125, %v2302_v4 }
0x11d0   : > { %v2304_v6 = vadd.f32 1e-05, %v2303_v33 }
0x11d2   : > { %3019 = vrsqrt.f32 %v2304_v6 }
0x11dc   : > { %v3020_v14 = vpop.eup %3019 }
0x11dd   : > { %v2306_v15 = vmul.f32 %v3020_v14, %v2298_v59 }
0x11df   : > { %v2311_v36 = vmul.f32 %v2310_v37, %v2306_v15 }
0x11e1   : > { %v2316_v19 = vadd.f32 %v2315_v16, %v2311_v36 }
0x11e3   : > { %2793 = vmatmul.mubr.msk.f32.vlgmr.msra.gmra.mrb[0].mxu0 %vm598_vm3, %v2316_v19 }
0x12b6   : > { %v2394_v32 = vpop.f32.mrb[0].mxu0 }
0x12b7   : > { %2398 = vst [vmem:[#allocation3] sm:$0x3] %v2394_v32  ;;  %v2794_v17 = vpop.f32.mrb[1].mxu0 }
0x12b8 PF: > { %s3129_s18 = smov [#allocation3]   ;;  %s2896_s20 = smul.u32 96, %s3217_s25 }
0x12b9   : > { %s2411_s22 = sshll.u32 %s3129_s18, 4  ;;  %s2425_s28 = sshll.u32 %s450_s11, 4  ;;  %s2412_s22 = int_to_ptr.vmem [resolvable:$true] %s2411_s22  ;;  %s2426_s28 = int_to_ptr.vmem [resolvable:$true] %s2425_s28 }
0x12ba   : > { %s3021_s29 = scalar_lea.vmem %s2412_s22, 32  ;;  %p3028_p3 = scmp.lt.s32.totalorder %s2412_s22, %s2412_s22 }
0x12bb   : > { %p3022_p13 = scmp.ne.s32.totalorder %s2412_s22, %s3021_s29  ;;  %p3029_p4 = scmp.lt.s32.totalorder %s3021_s29, %s3021_s29 }
0x12bd   : > { %p3023_p0 = pnand %p3022_p13, %p317_p2  ;;  %p3030_p7 = por %p3029_p4, %p3028_p3 }
0x12bf   : > { %p3024_p1 = pneg %p3023_p0 }
0x12c1   : > { %p3031_p8 = pnand %p3030_p7, %p3024_p1 }
0x12c3   : > { %3034 = shalt.err (!%p3031_p8)
}
0x12c4   : > { %s3882_s12 = sld [smem:[#allocation17_spill]] }
0x12ca   : > { %s3035_s21 = scalar_lea.hbm %s3882_s12, 32 }
0x12cb   : > { %p3036_p9 = scmp.ne.s32.totalorder %s3882_s12, %s3035_s21  ;;  %p3041_p12 = scmp.lt.u32.totalorder %s3035_s21, %s3882_s12 }
0x12cd   : > { %p3037_p10 = pnand %p3036_p9, %p317_p2 }
0x12cf   : > { %p3038_p11 = pneg %p3037_p10 }
0x12d1   : > { %p3043_p13 = pnand %p3041_p12, %p3038_p11 }
0x12d3   : > { %3046 = shalt.err (!%p3043_p13)
}
0x12d4   : > { %s3883_s27 = sld [smem:[#allocation10_spill]]  ;;  %s3885_s18 = sld [smem:[#allocation18_spill]] }
0x12d5   : > { %2898 = dma.vmem_to_hbm [thread:$0]  (%p317_p2), %s2412_s22, 32, %s3882_s12, [#allocation4]  }
0x12d6   : > { %s3047_s30 = scalar_lea.vmem %s2426_s28, 96  ;;  %s3130_s21 = smov [#allocation5]  }
0x12d7   : > { %p3048_p0 = scmp.ne.s32.totalorder %s2426_s28, %s3047_s30  ;;  %s3051_s13 = sshll.u32 %s3130_s21, 4  ;;  %s3052_s13 = int_to_ptr.vmem [resolvable:$false] %s3051_s13 }
0x12d8   : > { %s3053_s11 = scalar_lea.vmem %s3052_s13, 192  ;;  %p3054_p4 = scmp.lt.s32.totalorder %s2426_s28, %s3052_s13 }
0x12d9   : > { %p3049_p1 = pnand %p3048_p0, %p3236_p5  ;;  %p3055_p7 = scmp.lt.s32.totalorder %s3053_s11, %s3047_s30 }
0x12da   : > { %s3803_s29 = scalar_lea.hbm %s3885_s18, %s2896_s20  ;;  %s3886_s19 = sand.u32 1, %s3883_s27  }
0x12db   : > { %s2400_s26 = scalar_lea.sflag [#allocation6], %s3886_s19  ;;  %p3050_p3 = pneg %p3049_p1 }
0x12dc   : > { %p3056_p8 = por %p3055_p7, %p3054_p4 }
0x12de   : > { %p3057_p9 = pnand %p3056_p8, %p3050_p3 }
0x12e0   : > { %3060 = shalt.err (!%p3057_p9)
}
0x12e1   : > { %s3061_s22 = scalar_lea.hbm %s3803_s29, 96  ;;  %s3065_s23 = scalar_lea.hbm %s3885_s18, 192 }
0x12e2   : > { %p3062_p10 = scmp.ne.s32.totalorder %s3803_s29, %s3061_s22  ;;  %p3066_p13 = scmp.lt.u32.totalorder %s3803_s29, %s3885_s18 }
0x12e3   : > { %p3067_p0 = scmp.lt.u32.totalorder %s3065_s23, %s3061_s22  ;;  %p3069_p3 = scmp.lt.u32.totalorder %s3061_s22, %s3803_s29 }
0x12e4   : > { %p3063_p11 = pnand %p3062_p10, %p3236_p5 }
0x12e5   : > { %p3068_p1 = por %p3067_p0, %p3066_p13 }
0x12e6   : > { %p3064_p12 = pneg %p3063_p11 }
0x12e7   : > { %p3070_p4 = por %p3069_p3, %p3068_p1 }
0x12e9   : > { %p3071_p7 = pnand %p3070_p4, %p3064_p12 }
0x12eb   : > { %3074 = shalt.err (!%p3071_p7)
}
0x12ec   : > { %2899 = dma.vmem_to_hbm [thread:$0]  (%p3236_p5), %s2426_s28, 96, %s3803_s29, %s2400_s26  }
0x12ed   : > { %3092 = dma.done.wait (%p317_p2), [#allocation4], 32  }
0x12ee   : > { %3094 = vsyncadd (%p317_p2), [#allocation4], 4294967264 }
0x12ef PF: > { %s3887_s17 = sld [smem:[#allocation12_spill]]  ;;  %s3888_s15 = sld [smem:[#allocation9_spill]] }
0x12f5   : > { %p2909_p8 = scmp.ge.s32.totalorder %s3887_s17, 2  ;;  %s2441_s30 = sand.u32 1, %s3888_s15  }
0x12f6   : > { %s2442_s21 = scalar_lea.sflag [#allocation6], %s2441_s30 }
0x12f7   : > { %p2904_p9 = pnand %p2909_p8, %p3240_p6 }
0x12f9   : > { %3096 = dma.done.wait (!%p2904_p9), %s2442_s21, 96  }
0x12fa   : > { %3098 = vsyncadd (!%p2904_p9), %s2442_s21, 4294967200  ;;  %s3890_s24 = sld [smem:[#allocation13_spill]]  ;;  %s3891_s21 = sld [smem:[#allocation10_spill]] }
0x12fb   : > { %s3892_s22 = sld [smem:[#allocation11_spill]]  ;;  %s3893_s23 = sld [smem:[#allocation14_spill]] }
0x1300   : > { %p24_p5 = scmp.ge.s32.totalorder %s3890_s24, 4  }
0x1302   :  { %26 = sbr.rel (!%p24_p5) target bundleno = 7 (0x7), region = 125 }
0x1309   :  { %2447 = vsyncpa [#allocation4], 1 }
0x130a   :  { %2449 = vsyncpa [#allocation4 + $0x1], 1 }
0x130b   :  { %2450 = vsyncpa [#allocation6], 1 }
0x130c   :  { %2452 = vsyncpa [#allocation6 + $0x1], 1 }

</bundles_post_ra>
